<compile_context>
chip_gen: v7x
topology: tpu7x:2x2x1
jax: 0.10.0
libtpu: 0.0.40
codegen_flags: <defaults>
</compile_context>

<pallas_src>
import functools
import math

import jax
import jax.numpy as jnp
from jax.experimental import pallas as pl
from jax.experimental.pallas import tpu as pltpu


def _round_up(x, m):
    return ((x + m - 1) // m) * m


# ---------------------------------------------------------------------------
# Pallas kernel: fused 3x3 conv (stride 1, pad 1) + bias + ReLU
# ---------------------------------------------------------------------------
def _conv3x3_relu_kernel(x2_ref, w_ref, b_ref, o_ref, *, H, W, Cin):
    """One (batch, cout-tile) grid step.

    x2_ref : (S2p, Cin)     f32   zero-padded image, spatial dims flattened
                                  row-major; S2p >= (H+2)*(W+2) + 2
    w_ref  : (9, Cin, TN)   bf16  weights; leading dim is the tap index dy*3+dx
    b_ref  : (1, TN)        f32   bias (cout-padded)
    o_ref  : (H*(W+2), TN)  f32   conv output over the padded width; the two
                                  junk columns per image row are dropped outside
    """
    Wp = W + 2
    M = H * Wp
    acc = jnp.zeros((M, o_ref.shape[-1]), jnp.float32)
    # In-VMEM im2col: tap (dy, dx) of the 3x3 stencil is the contiguous row
    # window of the flattened padded image starting at dy*Wp + dx.  The input
    # is read from HBM once; only these cheap VMEM re-slices happen per tap.
    for dy in range(3):
        for dx in range(3):
            a = x2_ref[pl.ds(dy * Wp + dx, M), :].astype(jnp.bfloat16)  # (M, Cin)
            acc = acc + jnp.dot(a, w_ref[dy * 3 + dx],                  # (Cin, TN)
                                preferred_element_type=jnp.float32)
    o_ref[...] = jnp.maximum(acc + b_ref[...], 0.0).astype(o_ref.dtype)


# ---------------------------------------------------------------------------
# Wrapper: builds the forward fn (weights pre-laid-out once, here)
# ---------------------------------------------------------------------------
def make_encode_decode_block(weight, bias, *, tn=128):
    """ReLU(Conv2d(Cin, Cout, 3, stride=1, padding=1)) with PyTorch params.

    weight: (Cout, Cin, 3, 3) f32 (PyTorch OIHW), bias: (Cout,) f32.
    """
    Cout, Cin, KH, KW = weight.shape
    assert (KH, KW) == (3, 3)
    Np = _round_up(Cout, tn)

    # One-time weight relayout: (cout,cin,kh,kw) -> (tap, cin, cout), pad cout,
    # cast to bf16 (MXU-native).  Bias -> padded f32 row vector.
    wm = jnp.transpose(weight, (2, 3, 1, 0)).reshape(9, Cin, Cout)
    wm = jnp.pad(wm, ((0, 0), (0, 0), (0, Np - Cout))).astype(jnp.bfloat16)
    bm = jnp.pad(bias, (0, Np - Cout)).reshape(1, Np).astype(jnp.float32)

    def forward(x_nchw):
        N, C, H, W = x_nchw.shape
        assert C == Cin
        Wp = W + 2
        S2 = (H + 2) * Wp
        S2p = _round_up(S2 + 2, 8)   # +2 keeps the last tap's junk rows in-bounds
        M = H * Wp                   # output rows (incl. 2 junk cols per row)

        # NCHW -> NHWC, zero-pad the 3x3 halo, flatten spatial dims row-major
        # (contiguous reshape), pad a few zero rows at the end.
        x = jnp.transpose(x_nchw, (0, 2, 3, 1)).astype(jnp.float32)
        x2 = jnp.pad(x, ((0, 0), (1, 1), (1, 1), (0, 0))).reshape(N, S2, Cin)
        x2 = jnp.pad(x2, ((0, 0), (0, S2p - S2), (0, 0)))

        n_ct = Np // tn
        flops = 2 * N * M * Np * 9 * Cin
        bytes_accessed = (N * n_ct * S2p * Cin * 4          # activations (f32)
                          + N * n_ct * (9 * Cin * tn * 2 + tn * 4)  # weights+bias
                          + N * n_ct * M * tn * 4)          # output (f32)

        kernel = functools.partial(_conv3x3_relu_kernel, H=H, W=W, Cin=Cin)
        out = pl.pallas_call(
            kernel,
            out_shape=jax.ShapeDtypeStruct((N, M, Np), jnp.float32),
            grid_spec=pltpu.PrefetchScalarGridSpec(
                num_scalar_prefetch=0,
                grid=(N, n_ct),
                in_specs=[
                    pl.BlockSpec((None, S2p, Cin), lambda n, j: (n, 0, 0)),
                    pl.BlockSpec((9, Cin, tn), lambda n, j: (0, 0, j)),
                    pl.BlockSpec((1, tn), lambda n, j: (0, j)),
                ],
                out_specs=pl.BlockSpec((None, M, tn), lambda n, j: (n, 0, j)),
            ),
            compiler_params=pltpu.CompilerParams(
                dimension_semantics=("parallel", "parallel")),
            cost_estimate=pl.CostEstimate(
                flops=flops, transcendentals=0, bytes_accessed=bytes_accessed),
        )(x2, wm, bm)

        # Drop the 2 junk columns per row and the cout padding; back to NCHW.
        out = out.reshape(N, H, Wp, Np)[:, :, :W, :Cout]
        return jnp.transpose(out, (0, 3, 1, 2))

    return forward


# ---------------------------------------------------------------------------
# Parameter construction (mirrors PyTorch Conv2d default init, deterministic)
# ---------------------------------------------------------------------------
def init_encode_decode_block_params(key, in_channels, out_channels):
    wkey, bkey = jax.random.split(key)
    fan_in = in_channels * 9
    bound = 1.0 / math.sqrt(fan_in)
    weight = jax.random.uniform(wkey, (out_channels, in_channels, 3, 3),
                                jnp.float32, -bound, bound)
    bias = jax.random.uniform(bkey, (out_channels,), jnp.float32, -bound, bound)
    return weight, bias


# ---------------------------------------------------------------------------
# Main
# ---------------------------------------------------------------------------
if __name__ == "__main__":
    key = jax.random.PRNGKey(0)
    pkey, xkey = jax.random.split(key)

    in_channels, out_channels = 4, 32
    weight, bias = init_encode_decode_block_params(pkey, in_channels, out_channels)
    x = jax.random.normal(xkey, (2, in_channels, 16, 16), jnp.float32)  # NCHW

    fwd = jax.jit(make_encode_decode_block(weight, bias))
    out = jax.block_until_ready(fwd(x))

    assert out.shape == (2, out_channels, 16, 16), out.shape
    assert bool(jnp.all(jnp.isfinite(out)))
    assert bool(jnp.all(out >= 0.0))          # ReLU output is non-negative

    # Reference: f32 conv via lax (kernel uses bf16 MXU operands -> loose tol).
    ref = jax.lax.conv_general_dilated(
        x, weight, window_strides=(1, 1), padding=((1, 1), (1, 1)),
        dimension_numbers=("NCHW", "OIHW", "NCHW"))
    ref = jnp.maximum(ref + bias.reshape(1, -1, 1, 1), 0.0)
    max_err = float(jnp.max(jnp.abs(out - ref)))
    assert max_err < 1e-1, f"max abs err vs f32 reference: {max_err}"

    print("KERNEL_OK")
</pallas_src>

<mosaic_0001>
module attributes {stable_mosaic.version = 11 : i64} {
  func.func @_conv3x3_relu_kernel(%arg0: i32, %arg1: i32, %arg2: memref<1x328x4xf32, #tpu.memory_space<vmem>>, %arg3: memref<9x4x128xbf16, #tpu.memory_space<vmem>>, %arg4: memref<1x128xf32, #tpu.memory_space<vmem>>, %arg5: memref<1x288x128xf32, #tpu.memory_space<vmem>>) attributes {dimension_semantics = [#tpu.dimension_semantics<parallel>, #tpu.dimension_semantics<parallel>], iteration_bounds = array<i64: 2, 1>, scalar_prefetch = 0 : i64, scratch_operands = 0 : i64, tpu.core_type = #tpu.core_type<tc>, window_params = [{transform_indices = @transform_0, window_bounds = array<i64: 1, 328, 4>}, {transform_indices = @transform_1, window_bounds = array<i64: 9, 4, 128>}, {transform_indices = @transform_2, window_bounds = array<i64: 1, 128>}, {transform_indices = @transform_3, window_bounds = array<i64: 1, 288, 128>}]} {
    %cst = arith.constant 0.000000e+00 : f32
    %0 = vector.broadcast %cst : f32 to vector<288x128xf32>
    %c0 = arith.constant 0 : index
    %c0_0 = arith.constant 0 : index
    %c0_1 = arith.constant 0 : index
    %1 = vector.load %arg2[%c0, %c0_0, %c0_1] : memref<1x328x4xf32, #tpu.memory_space<vmem>>, vector<1x288x4xf32>
    %2 = vector.shape_cast %1 : vector<1x288x4xf32> to vector<288x4xf32>
    %3 = arith.truncf %2 : vector<288x4xf32> to vector<288x4xbf16>
    %c0_2 = arith.constant 0 : index
    %c0_3 = arith.constant 0 : index
    %c0_4 = arith.constant 0 : index
    %4 = vector.load %arg3[%c0_2, %c0_3, %c0_4] : memref<9x4x128xbf16, #tpu.memory_space<vmem>>, vector<1x4x128xbf16>
    %5 = vector.shape_cast %4 : vector<1x4x128xbf16> to vector<4x128xbf16>
    %cst_5 = arith.constant dense<0.000000e+00> : vector<288x128xf32>
    %6 = tpu.matmul %3, %5, %cst_5 {dimension_numbers = #tpu.dot_dimension_numbers<[1], [0], [0], [1], [0, 0, 1, 1], [], []>} : vector<288x4xbf16>, vector<4x128xbf16>, vector<288x128xf32> -> vector<288x128xf32>
    %7 = arith.addf %0, %6 : vector<288x128xf32>
    %c0_6 = arith.constant 0 : index
    %c1 = arith.constant 1 : index
    %c0_7 = arith.constant 0 : index
    %8 = vector.load %arg2[%c0_6, %c1, %c0_7] : memref<1x328x4xf32, #tpu.memory_space<vmem>>, vector<1x288x4xf32>
    %9 = vector.shape_cast %8 : vector<1x288x4xf32> to vector<288x4xf32>
    %10 = arith.truncf %9 : vector<288x4xf32> to vector<288x4xbf16>
    %c1_8 = arith.constant 1 : index
    %c0_9 = arith.constant 0 : index
    %c0_10 = arith.constant 0 : index
    %11 = vector.load %arg3[%c1_8, %c0_9, %c0_10] : memref<9x4x128xbf16, #tpu.memory_space<vmem>>, vector<1x4x128xbf16>
    %12 = vector.shape_cast %11 : vector<1x4x128xbf16> to vector<4x128xbf16>
    %cst_11 = arith.constant dense<0.000000e+00> : vector<288x128xf32>
    %13 = tpu.matmul %10, %12, %cst_11 {dimension_numbers = #tpu.dot_dimension_numbers<[1], [0], [0], [1], [0, 0, 1, 1], [], []>} : vector<288x4xbf16>, vector<4x128xbf16>, vector<288x128xf32> -> vector<288x128xf32>
    %14 = arith.addf %7, %13 : vector<288x128xf32>
    %c0_12 = arith.constant 0 : index
    %c2 = arith.constant 2 : index
    %c0_13 = arith.constant 0 : index
    %15 = vector.load %arg2[%c0_12, %c2, %c0_13] : memref<1x328x4xf32, #tpu.memory_space<vmem>>, vector<1x288x4xf32>
    %16 = vector.shape_cast %15 : vector<1x288x4xf32> to vector<288x4xf32>
    %17 = arith.truncf %16 : vector<288x4xf32> to vector<288x4xbf16>
    %c2_14 = arith.constant 2 : index
    %c0_15 = arith.constant 0 : index
    %c0_16 = arith.constant 0 : index
    %18 = vector.load %arg3[%c2_14, %c0_15, %c0_16] : memref<9x4x128xbf16, #tpu.memory_space<vmem>>, vector<1x4x128xbf16>
    %19 = vector.shape_cast %18 : vector<1x4x128xbf16> to vector<4x128xbf16>
    %cst_17 = arith.constant dense<0.000000e+00> : vector<288x128xf32>
    %20 = tpu.matmul %17, %19, %cst_17 {dimension_numbers = #tpu.dot_dimension_numbers<[1], [0], [0], [1], [0, 0, 1, 1], [], []>} : vector<288x4xbf16>, vector<4x128xbf16>, vector<288x128xf32> -> vector<288x128xf32>
    %21 = arith.addf %14, %20 : vector<288x128xf32>
    %c0_18 = arith.constant 0 : index
    %c18 = arith.constant 18 : index
    %c0_19 = arith.constant 0 : index
    %22 = vector.load %arg2[%c0_18, %c18, %c0_19] : memref<1x328x4xf32, #tpu.memory_space<vmem>>, vector<1x288x4xf32>
    %23 = vector.shape_cast %22 : vector<1x288x4xf32> to vector<288x4xf32>
    %24 = arith.truncf %23 : vector<288x4xf32> to vector<288x4xbf16>
    %c3 = arith.constant 3 : index
    %c0_20 = arith.constant 0 : index
    %c0_21 = arith.constant 0 : index
    %25 = vector.load %arg3[%c3, %c0_20, %c0_21] : memref<9x4x128xbf16, #tpu.memory_space<vmem>>, vector<1x4x128xbf16>
    %26 = vector.shape_cast %25 : vector<1x4x128xbf16> to vector<4x128xbf16>
    %cst_22 = arith.constant dense<0.000000e+00> : vector<288x128xf32>
    %27 = tpu.matmul %24, %26, %cst_22 {dimension_numbers = #tpu.dot_dimension_numbers<[1], [0], [0], [1], [0, 0, 1, 1], [], []>} : vector<288x4xbf16>, vector<4x128xbf16>, vector<288x128xf32> -> vector<288x128xf32>
    %28 = arith.addf %21, %27 : vector<288x128xf32>
    %c0_23 = arith.constant 0 : index
    %c19 = arith.constant 19 : index
    %c0_24 = arith.constant 0 : index
    %29 = vector.load %arg2[%c0_23, %c19, %c0_24] : memref<1x328x4xf32, #tpu.memory_space<vmem>>, vector<1x288x4xf32>
    %30 = vector.shape_cast %29 : vector<1x288x4xf32> to vector<288x4xf32>
    %31 = arith.truncf %30 : vector<288x4xf32> to vector<288x4xbf16>
    %c4 = arith.constant 4 : index
    %c0_25 = arith.constant 0 : index
    %c0_26 = arith.constant 0 : index
    %32 = vector.load %arg3[%c4, %c0_25, %c0_26] : memref<9x4x128xbf16, #tpu.memory_space<vmem>>, vector<1x4x128xbf16>
    %33 = vector.shape_cast %32 : vector<1x4x128xbf16> to vector<4x128xbf16>
    %cst_27 = arith.constant dense<0.000000e+00> : vector<288x128xf32>
    %34 = tpu.matmul %31, %33, %cst_27 {dimension_numbers = #tpu.dot_dimension_numbers<[1], [0], [0], [1], [0, 0, 1, 1], [], []>} : vector<288x4xbf16>, vector<4x128xbf16>, vector<288x128xf32> -> vector<288x128xf32>
    %35 = arith.addf %28, %34 : vector<288x128xf32>
    %c0_28 = arith.constant 0 : index
    %c20 = arith.constant 20 : index
    %c0_29 = arith.constant 0 : index
    %36 = vector.load %arg2[%c0_28, %c20, %c0_29] : memref<1x328x4xf32, #tpu.memory_space<vmem>>, vector<1x288x4xf32>
    %37 = vector.shape_cast %36 : vector<1x288x4xf32> to vector<288x4xf32>
    %38 = arith.truncf %37 : vector<288x4xf32> to vector<288x4xbf16>
    %c5 = arith.constant 5 : index
    %c0_30 = arith.constant 0 : index
    %c0_31 = arith.constant 0 : index
    %39 = vector.load %arg3[%c5, %c0_30, %c0_31] : memref<9x4x128xbf16, #tpu.memory_space<vmem>>, vector<1x4x128xbf16>
    %40 = vector.shape_cast %39 : vector<1x4x128xbf16> to vector<4x128xbf16>
    %cst_32 = arith.constant dense<0.000000e+00> : vector<288x128xf32>
    %41 = tpu.matmul %38, %40, %cst_32 {dimension_numbers = #tpu.dot_dimension_numbers<[1], [0], [0], [1], [0, 0, 1, 1], [], []>} : vector<288x4xbf16>, vector<4x128xbf16>, vector<288x128xf32> -> vector<288x128xf32>
    %42 = arith.addf %35, %41 : vector<288x128xf32>
    %c0_33 = arith.constant 0 : index
    %c36 = arith.constant 36 : index
    %c0_34 = arith.constant 0 : index
    %43 = vector.load %arg2[%c0_33, %c36, %c0_34] : memref<1x328x4xf32, #tpu.memory_space<vmem>>, vector<1x288x4xf32>
    %44 = vector.shape_cast %43 : vector<1x288x4xf32> to vector<288x4xf32>
    %45 = arith.truncf %44 : vector<288x4xf32> to vector<288x4xbf16>
    %c6 = arith.constant 6 : index
    %c0_35 = arith.constant 0 : index
    %c0_36 = arith.constant 0 : index
    %46 = vector.load %arg3[%c6, %c0_35, %c0_36] : memref<9x4x128xbf16, #tpu.memory_space<vmem>>, vector<1x4x128xbf16>
    %47 = vector.shape_cast %46 : vector<1x4x128xbf16> to vector<4x128xbf16>
    %cst_37 = arith.constant dense<0.000000e+00> : vector<288x128xf32>
    %48 = tpu.matmul %45, %47, %cst_37 {dimension_numbers = #tpu.dot_dimension_numbers<[1], [0], [0], [1], [0, 0, 1, 1], [], []>} : vector<288x4xbf16>, vector<4x128xbf16>, vector<288x128xf32> -> vector<288x128xf32>
    %49 = arith.addf %42, %48 : vector<288x128xf32>
    %c0_38 = arith.constant 0 : index
    %c37 = arith.constant 37 : index
    %c0_39 = arith.constant 0 : index
    %50 = vector.load %arg2[%c0_38, %c37, %c0_39] : memref<1x328x4xf32, #tpu.memory_space<vmem>>, vector<1x288x4xf32>
    %51 = vector.shape_cast %50 : vector<1x288x4xf32> to vector<288x4xf32>
    %52 = arith.truncf %51 : vector<288x4xf32> to vector<288x4xbf16>
    %c7 = arith.constant 7 : index
    %c0_40 = arith.constant 0 : index
    %c0_41 = arith.constant 0 : index
    %53 = vector.load %arg3[%c7, %c0_40, %c0_41] : memref<9x4x128xbf16, #tpu.memory_space<vmem>>, vector<1x4x128xbf16>
    %54 = vector.shape_cast %53 : vector<1x4x128xbf16> to vector<4x128xbf16>
    %cst_42 = arith.constant dense<0.000000e+00> : vector<288x128xf32>
    %55 = tpu.matmul %52, %54, %cst_42 {dimension_numbers = #tpu.dot_dimension_numbers<[1], [0], [0], [1], [0, 0, 1, 1], [], []>} : vector<288x4xbf16>, vector<4x128xbf16>, vector<288x128xf32> -> vector<288x128xf32>
    %56 = arith.addf %49, %55 : vector<288x128xf32>
    %c0_43 = arith.constant 0 : index
    %c38 = arith.constant 38 : index
    %c0_44 = arith.constant 0 : index
    %57 = vector.load %arg2[%c0_43, %c38, %c0_44] : memref<1x328x4xf32, #tpu.memory_space<vmem>>, vector<1x288x4xf32>
    %58 = vector.shape_cast %57 : vector<1x288x4xf32> to vector<288x4xf32>
    %59 = arith.truncf %58 : vector<288x4xf32> to vector<288x4xbf16>
    %c8 = arith.constant 8 : index
    %c0_45 = arith.constant 0 : index
    %c0_46 = arith.constant 0 : index
    %60 = vector.load %arg3[%c8, %c0_45, %c0_46] : memref<9x4x128xbf16, #tpu.memory_space<vmem>>, vector<1x4x128xbf16>
    %61 = vector.shape_cast %60 : vector<1x4x128xbf16> to vector<4x128xbf16>
    %cst_47 = arith.constant dense<0.000000e+00> : vector<288x128xf32>
    %62 = tpu.matmul %59, %61, %cst_47 {dimension_numbers = #tpu.dot_dimension_numbers<[1], [0], [0], [1], [0, 0, 1, 1], [], []>} : vector<288x4xbf16>, vector<4x128xbf16>, vector<288x128xf32> -> vector<288x128xf32>
    %63 = arith.addf %56, %62 : vector<288x128xf32>
    %c0_48 = arith.constant 0 : index
    %c0_49 = arith.constant 0 : index
    %64 = vector.load %arg4[%c0_48, %c0_49] : memref<1x128xf32, #tpu.memory_space<vmem>>, vector<1x128xf32>
    %65 = vector.broadcast %64 : vector<1x128xf32> to vector<288x128xf32>
    %66 = arith.addf %63, %65 : vector<288x128xf32>
    %cst_50 = arith.constant 0.000000e+00 : f32
    %67 = vector.broadcast %cst_50 : f32 to vector<288x128xf32>
    %68 = arith.maximumf %66, %67 : vector<288x128xf32>
    %c0_51 = arith.constant 0 : index
    %c0_52 = arith.constant 0 : index
    %c0_53 = arith.constant 0 : index
    %69 = vector.load %arg5[%c0_51, %c0_52, %c0_53] : memref<1x288x128xf32, #tpu.memory_space<vmem>>, vector<1x288x128xf32>
    %70 = vector.shape_cast %69 : vector<1x288x128xf32> to vector<288x128xf32>
    %71 = vector.shape_cast %68 : vector<288x128xf32> to vector<1x288x128xf32>
    tpu.vector_store %arg5[%c0_51, %c0_52, %c0_53], %71 {strides = array<i32>} : memref<1x288x128xf32, #tpu.memory_space<vmem>>, vector<1x288x128xf32>,
    return
  }
  func.func @transform_0(%arg0: i32, %arg1: i32) -> (i32, i32, i32) {
    %c0_i32 = arith.constant 0 : i32
    %c0_i32_0 = arith.constant 0 : i32
    %c0_i32_1 = arith.constant 0 : i32
    return %arg0, %c0_i32, %c0_i32_0 : i32, i32, i32
  }
  func.func @transform_1(%arg0: i32, %arg1: i32) -> (i32, i32, i32) {
    %c0_i32 = arith.constant 0 : i32
    %c0_i32_0 = arith.constant 0 : i32
    %c0_i32_1 = arith.constant 0 : i32
    return %c0_i32, %c0_i32_0, %arg1 : i32, i32, i32
  }
  func.func @transform_2(%arg0: i32, %arg1: i32) -> (i32, i32) {
    %c0_i32 = arith.constant 0 : i32
    %c0_i32_0 = arith.constant 0 : i32
    return %c0_i32, %arg1 : i32, i32
  }
  func.func @transform_3(%arg0: i32, %arg1: i32) -> (i32, i32, i32) {
    %c0_i32 = arith.constant 0 : i32
    %c0_i32_0 = arith.constant 0 : i32
    return %arg0, %c0_i32, %arg1 : i32, i32, i32
  }
}

</mosaic_0001>

<bundles_post_ra>
// kernel: forward.1
= control target key start
LH: loop header
LB: loop body
LE: loop exit
PB: predicated region body
PF: predicated region fallthrough
CT: control target
= control target key end

     0   :  { %s4371_s12 = smov 0   ;;  %s4373_s13 = smov 0   ;;  %s5142_s0 = inlined_call_operand.vmem [shape: f32[2,328,4], index: 0, kind: input, shape index: {}]   ;;  %s5143_s1 = inlined_call_operand.vmem [shape: bf16[9,4,128], index: 1, kind: input, shape index: {}]   ;;  %s5144_s2 = inlined_call_operand.vmem [shape: f32[1,128], index: 2, kind: input, shape index: {}]   ;;  %s5145_s3 = inlined_call_operand.vmem [shape: f32[2,288,128], index: 3, kind: output, shape index: {}]  }
   0x1   :  { %s4375_s14 = smov 0  }
   0x2 LB: > { %s25_s15 = sadd.s32 1, %s4345_s13  ;;  %p3312_p0 = scmp.ge.s32.totalorder %s4349_s14, 1  ;;  %s4349_s14 = sphi %s4375_s14, %s13_s14   ;;  %s4345_s13 = sphi %s4373_s13, %s5147_s13   ;;  %s4341_s12 = sphi %s4371_s12, %s5146_s12  }
   0x3   : > { %p27_p1 = scmp.ge.s32.totalorder %s25_s15, 2  ;;  %p168_p2 = scmp.lt.s32.totalorder %s4349_s14, 3 }
   0x5   : > { %s5149_s15 = smov (%p27_p1, %s25_s15), 0  ;;  %p169_p3 = pnand %p3312_p0, %p168_p2 }
   0x6   : > { %vm389_vm0 = vcmask (!%p169_p3), 1041408   ;;  %v4392_v0 = vld [vmem:[%s5143_s1 + $0x8] sm:$0x3] (!%p169_p3)  ;;  %v3315_v1 = vld [vmem:[%s5143_s1 + $0x2] sm:$0x3] (!%p169_p3)  ;;  %p202_p4 = scmp.lt.s32.totalorder (!%p169_p3), %s4341_s12, 1 }
   0x7   : > { %172 = sbr.rel (%p169_p3) target bundleno = 565 (0x235), region = 32  ;;  %4295 = vmatprep.subr.msk.bf16.mxu0 (!%p169_p3), %vm389_vm0, %v4392_v0  ;;  %4291 = vmatprep.subr.msk.bf16.mxu1 (!%p169_p3), %vm389_vm0, %v3315_v1  ;;  %v4402_v2 = vsel (!%p169_p3), %vm389_vm0, %v4392_v0, 0  ;;  %v391_v3 = vsel (!%p169_p3), %vm389_vm0, %v3315_v1, 0  ;;  %v3409_v4 = vld [vmem:[%s5143_s1 + $0xa] sm:$0x3] (!%p169_p3)  ;;  %vm334_vm1 = vcmask (!%p169_p3), 31744  }
   0x8   : > { %3812 = vmatpush3.bf16.msra.mxu0 (!%p169_p3), %v4402_v2  ;;  %3660 = vmatpush3.bf16.msra.mxu1 (!%p169_p3), %v391_v3  ;;  %v277_v5 = vld [vmem:[%s5143_s1] sm:$0x3] (!%p169_p3)  ;;  %v1893_v20 = vsel (!%p169_p3), %vm389_vm0, %v3409_v4, 0  ;;  %v4442_v26 = vld [vmem:[%s5143_s1 + $0xc] sm:$0x3] (!%p169_p3) }
   0x9   : > { %4297 = vmatprep.subr.msk.bf16.mxu0 (!%p169_p3), %vm389_vm0, %v3409_v4  ;;  %4292 = vmatprep.subr.msk.bf16.mxu1 (!%p169_p3), %vm389_vm0, %v277_v5  ;;  %v625_v18 = vsel (!%p169_p3), %vm389_vm0, %v277_v5, 0  ;;  %v4447_v27 = vld [vmem:[%s5143_s1 + $0x4] sm:$0x3] (!%p169_p3) }
   0xe   : > { %s5151_s12 = smov (!%p202_p4, %s4341_s12), 1 }
   0xf   : > { %s4301_s24 = smul.u32 328, %s5151_s12 }
  0x10   : > { %s4302_s11 = smul.u32 288, %s5151_s12 }
  0x11   : > { %s4420_s27 = scalar_lea.vmem %s5142_s0, %s4301_s24 }
  0x12   : > { %v278_v6 = vld [vmem:[%s4420_s27 + $0x1] sm:$0xff]  ;;  %v279_v7 = vld [vmem:[%s4420_s27 + $0x9] sm:$0xff]  ;;  %v1456_v8 = vld [vmem:[%s4420_s27 + $0x13] sm:$0xff]  ;;  %s5052_s20 = scalar_lea.vmem %s5145_s3, %s4302_s11 }
  0x13   : > { %v314_v9 = vpack.c.bf16 %v279_v7, %v278_v6  ;;  %v1457_v10 = vld [vmem:[%s4420_s27 + $0x1b] sm:$0xff]  ;;  %v280_v11 = vld [vmem:[%s4420_s27 + $0x11] sm:$0xff]  ;;  %v1458_v15 = vld [vmem:[%s4420_s27 + $0x23] sm:$0xff] }
  0x14   : > { %v281_v12 = vld [vmem:[%s4420_s27 + $0x19] sm:$0xff]  ;;  %v1492_v13 = vpack.c.bf16 %v1457_v10, %v1456_v8  ;;  %v1459_v16 = vld [vmem:[%s4420_s27 + $0x2b] sm:$0xff]  ;;  %v282_v17 = vld [vmem:[%s4420_s27 + $0x21] sm:$0xff] }
  0x15   : > { %v315_v14 = vpack.c.bf16 %v281_v12, %v280_v11  ;;  %3661 = vmatprep.mubr.msk.bf16.mxu1 %vm334_vm1, %v314_v9  ;;  %v1493_v19 = vpack.c.bf16 %v1459_v16, %v1458_v15  ;;  %v283_v21 = vld [vmem:[%s4420_s27 + $0x29] sm:$0xff]  ;;  %v1460_v22 = vld [vmem:[%s4420_s27 + $0x33] sm:$0xff]  ;;  %v1461_v23 = vld [vmem:[%s4420_s27 + $0x3b] sm:$0xff] }
  0x16   : > { %3813 = vmatprep.mubr.msk.bf16.mxu0 %vm334_vm1, %v1492_v13  ;;  %v316_v24 = vpack.c.bf16 %v283_v21, %v282_v17  ;;  %v1494_v25 = vpack.c.bf16 %v1461_v23, %v1460_v22  ;;  %v284_v28 = vld [vmem:[%s4420_s27 + $0x31] sm:$0xff]  ;;  %v285_v29 = vld [vmem:[%s4420_s27 + $0x39] sm:$0xff]  ;;  %v1462_v30 = vld [vmem:[%s4420_s27 + $0x43] sm:$0xff] }
  0x17   : > { %3662 = vmatmul.mubr.msk.bf16.vlgmr.msra.gmra.mrb[0].mxu1 %vm334_vm1, %v315_v14  ;;  %3814 = vmatmul.mubr.msk.bf16.vlgmr.msra.gmra.mrb[0].mxu0 %vm334_vm1, %v1493_v19  ;;  %v1463_v31 = vld [vmem:[%s4420_s27 + $0x4b] sm:$0xff]  ;;  %v286_v32 = vld [vmem:[%s4420_s27 + $0x41] sm:$0xff]  ;;  %v1464_v34 = vld [vmem:[%s4420_s27 + $0x53] sm:$0xff]  ;;  %v317_v36 = vpack.c.bf16 %v285_v29, %v284_v28  ;;  %v2219_v28 = vsel %vm389_vm0, %v4442_v26, 0 }
  0x18   : > { %3698 = vmatpush3.bf16.msra.mxu1 %v625_v18  ;;  %3850 = vmatpush3.bf16.msra.mxu0 %v1893_v20  ;;  %v287_v33 = vld [vmem:[%s4420_s27 + $0x49] sm:$0xff]  ;;  %v1465_v35 = vld [vmem:[%s4420_s27 + $0x5b] sm:$0xff]  ;;  %v1495_v37 = vpack.c.bf16 %v1463_v31, %v1462_v30  ;;  %v288_v40 = vld [vmem:[%s4420_s27 + $0x51] sm:$0xff] }
  0x19   : > { %3665 = vmatprep.mubr.msk.bf16.mxu1 %vm334_vm1, %v316_v24  ;;  %3817 = vmatprep.mubr.msk.bf16.mxu0 %vm334_vm1, %v1494_v25  ;;  %v318_v38 = vpack.c.bf16 %v287_v33, %v286_v32  ;;  %v1496_v39 = vpack.c.bf16 %v1465_v35, %v1464_v34  ;;  %v289_v41 = vld [vmem:[%s4420_s27 + $0x59] sm:$0xff]  ;;  %v1466_v42 = vld [vmem:[%s4420_s27 + $0x63] sm:$0xff]  ;;  %v1467_v43 = vld [vmem:[%s4420_s27 + $0x6b] sm:$0xff] }
  0x1a   : > { %4298 = vmatprep.subr.msk.bf16.mxu0 %vm389_vm0, %v4442_v26  ;;  %4293 = vmatprep.subr.msk.bf16.mxu1 %vm389_vm0, %v4447_v27  ;;  %v290_v44 = vld [vmem:[%s4420_s27 + $0x61] sm:$0xff]  ;;  %v291_v45 = vld [vmem:[%s4420_s27 + $0x69] sm:$0xff]  ;;  %v1468_v46 = vld [vmem:[%s4420_s27 + $0x73] sm:$0xff]  ;;  %v319_v48 = vpack.c.bf16 %v289_v41, %v288_v40  ;;  %v1497_v49 = vpack.c.bf16 %v1467_v43, %v1466_v42 }
  0x1b   : > { %v1469_v47 = vld [vmem:[%s4420_s27 + $0x7b] sm:$0xff]  ;;  %v320_v50 = vpack.c.bf16 %v291_v45, %v290_v44  ;;  %v292_v52 = vld [vmem:[%s4420_s27 + $0x71] sm:$0xff]  ;;  %v1470_v54 = vld [vmem:[%s4420_s27 + $0x83] sm:$0xff] }
  0x1c   : > { %v1498_v51 = vpack.c.bf16 %v1469_v47, %v1468_v46  ;;  %v293_v53 = vld [vmem:[%s4420_s27 + $0x79] sm:$0xff]  ;;  %v1471_v55 = vld [vmem:[%s4420_s27 + $0x8b] sm:$0xff]  ;;  %v294_v56 = vld [vmem:[%s4420_s27 + $0x81] sm:$0xff] }
  0x1d   : > { %v295_v57 = vld [vmem:[%s4420_s27 + $0x89] sm:$0xff]  ;;  %v1472_v58 = vld [vmem:[%s4420_s27 + $0x93] sm:$0xff]  ;;  %v1473_v59 = vld [vmem:[%s4420_s27 + $0x9b] sm:$0xff]  ;;  %v321_v60 = vpack.c.bf16 %v293_v53, %v292_v52  ;;  %v1499_v61 = vpack.c.bf16 %v1471_v55, %v1470_v54 }
  0x1e   : > { %v322_v62 = vpack.c.bf16 %v295_v57, %v294_v56  ;;  %v1500_v63 = vpack.c.bf16 %v1473_v59, %v1472_v58  ;;  %v296_v1 = vld [vmem:[%s4420_s27 + $0x91] sm:$0xff]  ;;  %v297_v3 = vld [vmem:[%s4420_s27 + $0x99] sm:$0xff]  ;;  %v1474_v4 = vld [vmem:[%s4420_s27 + $0xa3] sm:$0xff] }
  0x1f   : > { %3666 = vmatmul.mubr.msk.bf16.gmra.mrb[4].mxu1 %vm334_vm1, %v317_v36  ;;  %3818 = vmatmul.mubr.msk.bf16.gmra.mrb[4].mxu0 %vm334_vm1, %v1495_v37  ;;  %v1475_v5 = vld [vmem:[%s4420_s27 + $0xab] sm:$0xff]  ;;  %v298_v6 = vld [vmem:[%s4420_s27 + $0xa1] sm:$0xff]  ;;  %v1782_v8 = vld [vmem:[%s4420_s27 + $0x14] sm:$0xff]  ;;  %v323_v10 = vpack.c.bf16 %v297_v3, %v296_v1 }
  0x20   : > { %3669 = vmatprep.mubr.msk.bf16.mxu1 %vm334_vm1, %v318_v38  ;;  %3821 = vmatprep.mubr.msk.bf16.mxu0 %vm334_vm1, %v1496_v39  ;;  %v299_v7 = vld [vmem:[%s4420_s27 + $0xa9] sm:$0xff]  ;;  %v1783_v9 = vld [vmem:[%s4420_s27 + $0x1c] sm:$0xff]  ;;  %v1501_v11 = vpack.c.bf16 %v1475_v5, %v1474_v4  ;;  %v300_v14 = vld [vmem:[%s4420_s27 + $0xb1] sm:$0xff] }
  0x21   : > { %v324_v12 = vpack.c.bf16 %v299_v7, %v298_v6  ;;  %v1818_v13 = vpack.c.bf16 %v1783_v9, %v1782_v8  ;;  %v301_v15 = vld [vmem:[%s4420_s27 + $0xb9] sm:$0xff]  ;;  %v1784_v16 = vld [vmem:[%s4420_s27 + $0x24] sm:$0xff]  ;;  %v1785_v17 = vld [vmem:[%s4420_s27 + $0x2c] sm:$0xff] }
  0x22   : > { %v302_v18 = vld [vmem:[%s4420_s27 + $0xc1] sm:$0xff]  ;;  %v303_v19 = vld [vmem:[%s4420_s27 + $0xc9] sm:$0xff]  ;;  %v1786_v20 = vld [vmem:[%s4420_s27 + $0x34] sm:$0xff]  ;;  %v325_v22 = vpack.c.bf16 %v301_v15, %v300_v14  ;;  %v4512_v23 = vpack.c.bf16 %v1785_v17, %v1784_v16  ;;  %v915_v15 = vsel %vm389_vm0, %v4447_v27, 0 }
  0x23   : > { %v1787_v21 = vld [vmem:[%s4420_s27 + $0x3c] sm:$0xff]  ;;  %v326_v24 = vpack.c.bf16 %v303_v19, %v302_v18  ;;  %v4522_v29 = vld [vmem:[%s5143_s1 + $0xe] sm:$0x3]  ;;  %v304_v30 = vld [vmem:[%s4420_s27 + $0xd1] sm:$0xff] }
  0x24   : > { %v4514_v25 = vpack.c.bf16 %v1787_v21, %v1786_v20  ;;  %v305_v31 = vld [vmem:[%s4420_s27 + $0xd9] sm:$0xff]  ;;  %v1788_v32 = vld [vmem:[%s4420_s27 + $0x44] sm:$0xff]  ;;  %v1789_v26 = vld [vmem:[%s4420_s27 + $0x4c] sm:$0xff] }
  0x25   : > { %v306_v33 = vld [vmem:[%s4420_s27 + $0xe1] sm:$0xff]  ;;  %v307_v34 = vld [vmem:[%s4420_s27 + $0xe9] sm:$0xff]  ;;  %v1790_v35 = vld [vmem:[%s4420_s27 + $0x54] sm:$0xff]  ;;  %v327_v37 = vpack.c.bf16 %v305_v31, %v304_v30  ;;  %v4539_v38 = vpack.c.bf16 %v1789_v26, %v1788_v32 }
  0x26   : > { %v1791_v36 = vld [vmem:[%s4420_s27 + $0x5c] sm:$0xff]  ;;  %v328_v39 = vpack.c.bf16 %v307_v34, %v306_v33  ;;  %v308_v41 = vld [vmem:[%s4420_s27 + $0xf1] sm:$0xff]  ;;  %v1792_v43 = vld [vmem:[%s4420_s27 + $0x64] sm:$0xff] }
  0x27   : > { %3670 = vmatmul.mubr.msk.bf16.gmra.mrb[8].mxu1 %vm334_vm1, %v319_v48  ;;  %3822 = vmatmul.mubr.msk.bf16.gmra.mrb[8].mxu0 %vm334_vm1, %v1497_v49  ;;  %v4541_v40 = vpack.c.bf16 %v1791_v36, %v1790_v35  ;;  %v309_v42 = vld [vmem:[%s4420_s27 + $0xf9] sm:$0xff]  ;;  %v1793_v44 = vld [vmem:[%s4420_s27 + $0x6c] sm:$0xff]  ;;  %v310_v45 = vld [vmem:[%s4420_s27 + $0x101] sm:$0xff] }
  0x28   : > { %3673 = vmatprep.mubr.msk.bf16.mxu1 %vm334_vm1, %v320_v50  ;;  %3825 = vmatprep.mubr.msk.bf16.mxu0 %vm334_vm1, %v1498_v51  ;;  %v311_v46 = vld [vmem:[%s4420_s27 + $0x109] sm:$0xff]  ;;  %v1794_v47 = vld [vmem:[%s4420_s27 + $0x74] sm:$0xff]  ;;  %v1795_v48 = vld [vmem:[%s4420_s27 + $0x7c] sm:$0xff]  ;;  %v329_v49 = vpack.c.bf16 %v309_v42, %v308_v41  ;;  %v4557_v50 = vpack.c.bf16 %v1793_v44, %v1792_v43 }
  0x29   : > { %v330_v51 = vpack.c.bf16 %v311_v46, %v310_v45  ;;  %v4559_v52 = vpack.c.bf16 %v1795_v48, %v1794_v47  ;;  %v312_v53 = vld [vmem:[%s4420_s27 + $0x111] sm:$0xff]  ;;  %v313_v54 = vld [vmem:[%s4420_s27 + $0x119] sm:$0xff]  ;;  %v1796_v55 = vld [vmem:[%s4420_s27 + $0x84] sm:$0xff] }
  0x2a   : > { %v1797_v56 = vld [vmem:[%s4420_s27 + $0x8c] sm:$0xff]  ;;  %v223_v57 = vld [vmem:[%s4420_s27] sm:$0xff]  ;;  %v1798_v59 = vld [vmem:[%s4420_s27 + $0x94] sm:$0xff] }
  0x2b   : > { %v224_v58 = vld [vmem:[%s4420_s27 + $0x8] sm:$0xff]  ;;  %v225_v3 = vld [vmem:[%s4420_s27 + $0x10] sm:$0xff]  ;;  %v226_v4 = vld [vmem:[%s4420_s27 + $0x18] sm:$0xff] }
  0x2c   : > { %v1800_v5 = vld [vmem:[%s4420_s27 + $0xa4] sm:$0xff]  ;;  %v1801_v6 = vld [vmem:[%s4420_s27 + $0xac] sm:$0xff]  ;;  %v1802_v9 = vld [vmem:[%s4420_s27 + $0xb4] sm:$0xff] }
  0x2d   : > { %v227_v7 = vld [vmem:[%s4420_s27 + $0x20] sm:$0xff]  ;;  %v228_v8 = vld [vmem:[%s4420_s27 + $0x28] sm:$0xff]  ;;  %v229_v17 = vld [vmem:[%s4420_s27 + $0x30] sm:$0xff] }
  0x2e   : > { %v4603_v16 = vld [vmem:[%s5143_s1 + $0x6] sm:$0x3]  ;;  %v230_v18 = vld [vmem:[%s4420_s27 + $0x38] sm:$0xff]  ;;  %v1805_v27 = vld [vmem:[%s4420_s27 + $0xcc] sm:$0xff] }
  0x2f   : > { %3674 = vmatmul.mubr.msk.bf16.gmra.mrb[12].mxu1 %vm334_vm1, %v321_v60  ;;  %3826 = vmatmul.mubr.msk.bf16.gmra.mrb[12].mxu0 %vm334_vm1, %v1499_v61  ;;  %v1799_v60 = vld [vmem:[%s4420_s27 + $0x9c] sm:$0xff]  ;;  %v331_v61 = vpack.c.bf16 %v313_v54, %v312_v53  ;;  %v1804_v19 = vld [vmem:[%s4420_s27 + $0xc4] sm:$0xff]  ;;  %v233_v26 = vld [vmem:[%s4420_s27 + $0x50] sm:$0xff] }
  0x30   : > { %3677 = vmatprep.mubr.msk.bf16.mxu1 %vm334_vm1, %v322_v62  ;;  %3829 = vmatprep.mubr.msk.bf16.mxu0 %vm334_vm1, %v1500_v63  ;;  %v4575_v62 = vpack.c.bf16 %v1797_v56, %v1796_v55  ;;  %v259_v63 = vpack.c.bf16 %v224_v58, %v223_v57  ;;  %v4577_v1 = vpack.c.bf16 %v1799_v60, %v1798_v59  ;;  %v231_v20 = vld [vmem:[%s4420_s27 + $0x40] sm:$0xff]  ;;  %v232_v21 = vld [vmem:[%s4420_s27 + $0x48] sm:$0xff]  ;;  %v234_v33 = vld [vmem:[%s4420_s27 + $0x58] sm:$0xff] }
  0x31   : > { %v4620_v30 = vpack.c.bf16 %v1805_v27, %v1804_v19  ;;  %v263_v31 = vpack.c.bf16 %v232_v21, %v231_v20  ;;  %v1808_v34 = vld [vmem:[%s4420_s27 + $0xe4] sm:$0xff]  ;;  %v1809_v35 = vld [vmem:[%s4420_s27 + $0xec] sm:$0xff]  ;;  %v1811_v41 = vld [vmem:[%s4420_s27 + $0xfc] sm:$0xff]  ;;  %v264_v42 = vpack.c.bf16 %v234_v33, %v233_v26 }
  0x32   : > { %v235_v36 = vld [vmem:[%s4420_s27 + $0x60] sm:$0xff]  ;;  %v4638_v43 = vpack.c.bf16 %v1809_v35, %v1808_v34  ;;  %v237_v46 = vld [vmem:[%s4420_s27 + $0x70] sm:$0xff]  ;;  %v238_v47 = vld [vmem:[%s4420_s27 + $0x78] sm:$0xff] }
  0x33   : > { %v1812_v48 = vld [vmem:[%s4420_s27 + $0x104] sm:$0xff]  ;;  %v1814_v54 = vld [vmem:[%s4420_s27 + $0x114] sm:$0xff]  ;;  %v1815_v55 = vld [vmem:[%s4420_s27 + $0x11c] sm:$0xff]  ;;  %v266_v56 = vpack.c.bf16 %v238_v47, %v237_v46 }
  0x34   : > { %v240_v53 = vld [vmem:[%s4420_s27 + $0x88] sm:$0xff]  ;;  %v4658_v59 = vpack.c.bf16 %v1815_v55, %v1814_v54  ;;  %v241_v60 = vld [vmem:[%s4420_s27 + $0x90] sm:$0xff]  ;;  %v250_v27 = vld [vmem:[%s4420_s27 + $0xd8] sm:$0xff] }
  0x35   : > { %v4690_v19 = vld [vmem:[%s5143_s1 + $0x10] sm:$0x3]  ;;  %v252_v20 = vld [vmem:[%s4420_s27 + $0xe8] sm:$0xff]  ;;  %v258_v33 = vld [vmem:[%s4420_s27 + $0x118] sm:$0xff] }
  0x36   : > { %v805_v34 = vld [vmem:[%s4420_s27 + $0xa] sm:$0xff]  ;;  %v820_v54 = vld [vmem:[%s4420_s27 + $0x82] sm:$0xff] }
  0x37   : > { %3678 = vmatmul.mubr.msk.bf16.gmra.mrb[16].mxu1 %vm334_vm1, %v323_v10  ;;  %3830 = vmatmul.mubr.msk.bf16.gmra.mrb[16].mxu0 %vm334_vm1, %v1501_v11  ;;  %v1803_v10 = vld [vmem:[%s4420_s27 + $0xbc] sm:$0xff]  ;;  %v260_v11 = vpack.c.bf16 %v226_v4, %v225_v3  ;;  %v1817_v3 = vld [vmem:[%s4420_s27 + $0x12c] sm:$0xff] }
  0x38   : > { %3681 = vmatprep.mubr.msk.bf16.mxu1 %vm334_vm1, %v324_v12  ;;  %3851 = vmatprep.mubr.msk.bf16.mxu0 %vm334_vm1, %v1818_v13  ;;  %v4593_v12 = vpack.c.bf16 %v1801_v6, %v1800_v5  ;;  %v261_v13 = vpack.c.bf16 %v228_v8, %v227_v7  ;;  %v4595_v14 = vpack.c.bf16 %v1803_v10, %v1802_v9  ;;  %v243_v4 = vld [vmem:[%s4420_s27 + $0xa0] sm:$0xff]  ;;  %v244_v5 = vld [vmem:[%s4420_s27 + $0xa8] sm:$0xff]  ;;  %v245_v9 = vld [vmem:[%s4420_s27 + $0xb0] sm:$0xff] }
  0x39   : > { %v269_v8 = vpack.c.bf16 %v244_v5, %v243_v4  ;;  %v246_v10 = vld [vmem:[%s4420_s27 + $0xb8] sm:$0xff]  ;;  %v813_v46 = vld [vmem:[%s4420_s27 + $0x4a] sm:$0xff] }
  0x3a   : > { %v821_v55 = vld [vmem:[%s4420_s27 + $0x8a] sm:$0xff] }
  0x3b   : > { %v2434_v4 = vld [vmem:[%s4420_s27 + $0x25] sm:$0xff] }
  0x3f   : > { %3682 = vmatmul.mubr.msk.bf16.gmra.mrb[20].mxu1 %vm334_vm1, %v325_v22  ;;  %3852 = vmatmul.mubr.msk.bf16.vlgmr.msra.gmra.mrb[0].mxu0 %vm334_vm1, %v4512_v23  ;;  %v1806_v22 = vld [vmem:[%s4420_s27 + $0xd4] sm:$0xff] }
  0x40   : > { %3685 = vmatprep.mubr.msk.bf16.mxu1 %vm334_vm1, %v326_v24  ;;  %3888 = vmatpush3.bf16.msra.mxu0 %v2219_v28  ;;  %v1807_v24 = vld [vmem:[%s4420_s27 + $0xdc] sm:$0xff]  ;;  %v262_v28 = vpack.c.bf16 %v230_v18, %v229_v17  ;;  %v2545_v18 = vsel %vm389_vm0, %v4522_v29, 0 }
  0x41   : > { %3855 = vmatprep.mubr.msk.bf16.mxu0 %vm334_vm1, %v4514_v25  ;;  %4299 = vmatprep.subr.msk.bf16.mxu0 %vm389_vm0, %v4522_v29  ;;  %v4622_v32 = vpack.c.bf16 %v1807_v24, %v1806_v22  ;;  %v251_v29 = vld [vmem:[%s4420_s27 + $0xe0] sm:$0xff] }
  0x42   : > { %v273_v22 = vpack.c.bf16 %v252_v20, %v251_v29  ;;  %v255_v24 = vld [vmem:[%s4420_s27 + $0x100] sm:$0xff] }
  0x47   : > { %3686 = vmatmul.mubr.msk.bf16.gmra.mrb[24].mxu1 %vm334_vm1, %v327_v37  ;;  %3856 = vmatmul.mubr.msk.bf16.gmra.mrb[4].mxu0 %vm334_vm1, %v4539_v38  ;;  %v236_v37 = vld [vmem:[%s4420_s27 + $0x68] sm:$0xff] }
  0x48   : > { %3689 = vmatprep.mubr.msk.bf16.mxu1 %vm334_vm1, %v328_v39  ;;  %3859 = vmatprep.mubr.msk.bf16.mxu0 %vm334_vm1, %v4541_v40  ;;  %v1810_v39 = vld [vmem:[%s4420_s27 + $0xf4] sm:$0xff]  ;;  %v265_v44 = vpack.c.bf16 %v236_v37, %v235_v36 }
  0x49   : > { %v4640_v45 = vpack.c.bf16 %v1811_v41, %v1810_v39  ;;  %v807_v37 = vld [vmem:[%s4420_s27 + $0x1a] sm:$0xff]  ;;  %v809_v39 = vld [vmem:[%s4420_s27 + $0x2a] sm:$0xff] }
  0x4f   : > { %3690 = vmatmul.mubr.msk.bf16.gmra.mrb[28].mxu1 %vm334_vm1, %v329_v49  ;;  %3860 = vmatmul.mubr.msk.bf16.gmra.mrb[8].mxu0 %vm334_vm1, %v4557_v50  ;;  %v1813_v49 = vld [vmem:[%s4420_s27 + $0x10c] sm:$0xff] }
  0x50   : > { %3693 = vmatprep.mubr.msk.bf16.mxu1 %vm334_vm1, %v330_v51  ;;  %3863 = vmatprep.mubr.msk.bf16.mxu0 %vm334_vm1, %v4559_v52  ;;  %v239_v51 = vld [vmem:[%s4420_s27 + $0x80] sm:$0xff]  ;;  %v4656_v57 = vpack.c.bf16 %v1813_v49, %v1812_v48  ;;  %v817_v49 = vld [vmem:[%s4420_s27 + $0x6a] sm:$0xff] }
  0x51   : > { %v267_v58 = vpack.c.bf16 %v240_v53, %v239_v51  ;;  %v815_v48 = vld [vmem:[%s4420_s27 + $0x5a] sm:$0xff] }
  0x57   : > { %3694 = vmatmul.mubr.msk.bf16.gmra.mrb[32].mxu1 %vm334_vm1, %v331_v61  ;;  %3864 = vmatmul.mubr.msk.bf16.gmra.mrb[12].mxu0 %vm334_vm1, %v4575_v62  ;;  %v242_v61 = vld [vmem:[%s4420_s27 + $0x98] sm:$0xff] }
  0x58   : > { %3699 = vmatprep.mubr.msk.bf16.mxu1 %vm334_vm1, %v259_v63  ;;  %3867 = vmatprep.mubr.msk.bf16.mxu0 %vm334_vm1, %v4577_v1  ;;  %v1816_v63 = vld [vmem:[%s4420_s27 + $0x124] sm:$0xff]  ;;  %v268_v6 = vpack.c.bf16 %v242_v61, %v241_v60  ;;  %v823_v60 = vld [vmem:[%s4420_s27 + $0x9a] sm:$0xff] }
  0x59   : > { %v4672_v7 = vpack.c.bf16 %v1817_v3, %v1816_v63  ;;  %v2143_v61 = vld [vmem:[%s4420_s27 + $0x13c] sm:$0xff]  ;;  %v825_v3 = vld [vmem:[%s4420_s27 + $0xaa] sm:$0xff] }
  0x5a   : > { %v824_v63 = vld [vmem:[%s4420_s27 + $0xa2] sm:$0xff] }
  0x5f   : > { %3700 = vmatmul.mubr.msk.bf16.vlgmr.msra.gmra.mrb[0].mxu1 %vm334_vm1, %v260_v11  ;;  %3868 = vmatmul.mubr.msk.bf16.gmra.mrb[16].mxu0 %vm334_vm1, %v4593_v12  ;;  %v247_v11 = vld [vmem:[%s4420_s27 + $0xc0] sm:$0xff] }
  0x60   : > { %3703 = vmatprep.mubr.msk.bf16.mxu1 %vm334_vm1, %v261_v13  ;;  %3871 = vmatprep.mubr.msk.bf16.mxu0 %vm334_vm1, %v4595_v14  ;;  %v248_v13 = vld [vmem:[%s4420_s27 + $0xc8] sm:$0xff] }
  0x61   : > { %3736 = vmatpush3.bf16.msra.mxu1 %v915_v15  ;;  %v270_v15 = vpack.c.bf16 %v246_v10, %v245_v9  ;;  %v271_v17 = vpack.c.bf16 %v248_v13, %v247_v11  ;;  %v827_v10 = vld [vmem:[%s4420_s27 + $0xba] sm:$0xff] }
  0x62   : > { %4294 = vmatprep.subr.msk.bf16.mxu1 %vm389_vm0, %v4603_v16  ;;  %v2436_v11 = vld [vmem:[%s4420_s27 + $0x35] sm:$0xff]  ;;  %v2437_v13 = vld [vmem:[%s4420_s27 + $0x3d] sm:$0xff] }
  0x63   : > { %v2471_v29 = vpack.c.bf16 %v2437_v13, %v2436_v11 }
  0x67   : > { %3704 = vmatmul.mubr.msk.bf16.gmra.mrb[4].mxu1 %vm334_vm1, %v262_v28  ;;  %3872 = vmatmul.mubr.msk.bf16.gmra.mrb[20].mxu0 %vm334_vm1, %v4620_v30  ;;  %v256_v28 = vld [vmem:[%s4420_s27 + $0x108] sm:$0xff] }
  0x68   : > { %3707 = vmatprep.mubr.msk.bf16.mxu1 %vm334_vm1, %v263_v31  ;;  %3875 = vmatprep.mubr.msk.bf16.mxu0 %vm334_vm1, %v4622_v32  ;;  %v275_v26 = vpack.c.bf16 %v256_v28, %v255_v24  ;;  %v2440_v24 = vld [vmem:[%s4420_s27 + $0x55] sm:$0xff]  ;;  %v2441_v28 = vld [vmem:[%s4420_s27 + $0x5d] sm:$0xff] }
  0x6f   : > { %3708 = vmatmul.mubr.msk.bf16.gmra.mrb[8].mxu1 %vm334_vm1, %v264_v42  ;;  %3876 = vmatmul.mubr.msk.bf16.gmra.mrb[24].mxu0 %vm334_vm1, %v4638_v43 }
  0x70   : > { %3711 = vmatprep.mubr.msk.bf16.mxu1 %vm334_vm1, %v265_v44  ;;  %3879 = vmatprep.mubr.msk.bf16.mxu0 %vm334_vm1, %v4640_v45  ;;  %v1241_v44 = vsel %vm389_vm0, %v4603_v16, 0  ;;  %v812_v16 = vld [vmem:[%s4420_s27 + $0x42] sm:$0xff] }
  0x77   : > { %3712 = vmatmul.mubr.msk.bf16.gmra.mrb[12].mxu1 %vm334_vm1, %v266_v56  ;;  %3880 = vmatmul.mubr.msk.bf16.gmra.mrb[28].mxu0 %vm334_vm1, %v4656_v57 }
  0x78   : > { %3715 = vmatprep.mubr.msk.bf16.mxu1 %vm334_vm1, %v267_v58  ;;  %3883 = vmatprep.mubr.msk.bf16.mxu0 %vm334_vm1, %v4658_v59  ;;  %v4787_v58 = vpack.c.bf16 %v821_v55, %v820_v54  ;;  %v2450_v54 = vld [vmem:[%s4420_s27 + $0xa5] sm:$0xff]  ;;  %v2451_v55 = vld [vmem:[%s4420_s27 + $0xad] sm:$0xff] }
  0x7f   : > { %3716 = vmatmul.mubr.msk.bf16.gmra.mrb[16].mxu1 %vm334_vm1, %v268_v6  ;;  %3884 = vmatmul.mubr.msk.bf16.gmra.mrb[32].mxu0 %vm334_vm1, %v4672_v7 }
  0x80   : > { %3719 = vmatprep.mubr.msk.bf16.mxu1 %vm334_vm1, %v269_v8  ;;  %3889 = vmatprep.mubr.msk.bf16.mxu0 %vm334_vm1, %v4512_v23  ;;  %v249_v23 = vld [vmem:[%s4420_s27 + $0xd0] sm:$0xff]  ;;  %v4807_v8 = vpack.c.bf16 %v825_v3, %v824_v63  ;;  %v2453_v63 = vld [vmem:[%s4420_s27 + $0xbd] sm:$0xff]  ;;  %v2454_v3 = vld [vmem:[%s4420_s27 + $0xc5] sm:$0xff] }
  0x81   : > { %v272_v21 = vpack.c.bf16 %v250_v27, %v249_v23  ;;  %v2439_v23 = vld [vmem:[%s4420_s27 + $0x4d] sm:$0xff] }
  0x87   : > { %3720 = vmatmul.mubr.msk.bf16.gmra.mrb[20].mxu1 %vm334_vm1, %v270_v15  ;;  %3890 = vmatmul.mubr.msk.bf16.vlgmr.msra.gmra.mrb[0].mxu0 %vm334_vm1, %v4514_v25  ;;  %v253_v25 = vld [vmem:[%s4420_s27 + $0xf0] sm:$0xff]  ;;  %v828_v15 = vld [vmem:[%s4420_s27 + $0xc2] sm:$0xff] }
  0x88   : > { %3723 = vmatprep.mubr.msk.bf16.mxu1 %vm334_vm1, %v271_v17  ;;  %3926 = vmatpush3.bf16.msra.mxu0 %v2545_v18  ;;  %v829_v17 = vld [vmem:[%s4420_s27 + $0xca] sm:$0xff] }
  0x89   : > { %3893 = vmatprep.mubr.msk.bf16.mxu0 %vm334_vm1, %v4539_v38  ;;  %4300 = vmatprep.subr.msk.bf16.mxu0 %vm389_vm0, %v4690_v19  ;;  %v254_v38 = vld [vmem:[%s4420_s27 + $0xf8] sm:$0xff]  ;;  %v2438_v18 = vld [vmem:[%s4420_s27 + $0x45] sm:$0xff]  ;;  %v4825_v20 = vpack.c.bf16 %v829_v17, %v828_v15  ;;  %v2463_v15 = vld [vmem:[%s4420_s27 + $0x10d] sm:$0xff] }
  0x8a   : > { %v274_v31 = vpack.c.bf16 %v254_v38, %v253_v25  ;;  %v830_v25 = vld [vmem:[%s4420_s27 + $0xd2] sm:$0xff]  ;;  %v831_v38 = vld [vmem:[%s4420_s27 + $0xda] sm:$0xff] }
  0x8f   : > { %3724 = vmatmul.mubr.msk.bf16.gmra.mrb[24].mxu1 %vm334_vm1, %v272_v21  ;;  %3894 = vmatmul.mubr.msk.bf16.gmra.mrb[4].mxu0 %vm334_vm1, %v4541_v40  ;;  %v257_v40 = vld [vmem:[%s4420_s27 + $0x110] sm:$0xff]  ;;  %v2472_v21 = vpack.c.bf16 %v2439_v23, %v2438_v18  ;;  %v2466_v23 = vld [vmem:[%s4420_s27 + $0x125] sm:$0xff] }
  0x90   : > { %3727 = vmatprep.mubr.msk.bf16.mxu1 %vm334_vm1, %v273_v22  ;;  %3897 = vmatprep.mubr.msk.bf16.mxu0 %vm334_vm1, %v4557_v50  ;;  %v804_v50 = vld [vmem:[%s4420_s27 + $0x2] sm:$0xff]  ;;  %v276_v35 = vpack.c.bf16 %v258_v33, %v257_v40  ;;  %v2871_v22 = vsel %vm389_vm0, %v4690_v19, 0  ;;  %v2443_v40 = vld [vmem:[%s4420_s27 + $0x6d] sm:$0xff]  ;;  %v4843_v33 = vpack.c.bf16 %v831_v38, %v830_v25 }
  0x91   : > { %v840_v36 = vpack.c.bf16 %v805_v34, %v804_v50  ;;  %v832_v19 = vld [vmem:[%s4420_s27 + $0xe2] sm:$0xff]  ;;  %v2473_v50 = vpack.c.bf16 %v2441_v28, %v2440_v24  ;;  %v2761_v38 = vld [vmem:[%s4420_s27 + $0x2e] sm:$0xff] }
  0x92   : > { %v2760_v25 = vld [vmem:[%s4420_s27 + $0x26] sm:$0xff] }
  0x93   : > { %v2796_v28 = vpack.c.bf16 %v2761_v38, %v2760_v25  ;;  %v2788_v25 = vld [vmem:[%s4420_s27 + $0x106] sm:$0xff]  ;;  %v2789_v38 = vld [vmem:[%s4420_s27 + $0x10e] sm:$0xff] }
  0x97   : > { %3728 = vmatmul.mubr.msk.bf16.gmra.mrb[28].mxu1 %vm334_vm1, %v274_v31  ;;  %3898 = vmatmul.mubr.msk.bf16.gmra.mrb[8].mxu0 %vm334_vm1, %v4559_v52  ;;  %v806_v52 = vld [vmem:[%s4420_s27 + $0x12] sm:$0xff]  ;;  %v833_v31 = vld [vmem:[%s4420_s27 + $0xea] sm:$0xff] }
  0x98   : > { %3731 = vmatprep.mubr.msk.bf16.mxu1 %vm334_vm1, %v275_v26  ;;  %3901 = vmatprep.mubr.msk.bf16.mxu0 %vm334_vm1, %v4575_v62  ;;  %v808_v62 = vld [vmem:[%s4420_s27 + $0x22] sm:$0xff]  ;;  %v4733_v41 = vpack.c.bf16 %v807_v37, %v806_v52  ;;  %v4845_v34 = vpack.c.bf16 %v833_v31, %v832_v19  ;;  %v835_v52 = vld [vmem:[%s4420_s27 + $0xfa] sm:$0xff]  ;;  %v2765_v31 = vld [vmem:[%s4420_s27 + $0x4e] sm:$0xff] }
  0x99   : > { %v4735_v42 = vpack.c.bf16 %v809_v39, %v808_v62  ;;  %v2442_v26 = vld [vmem:[%s4420_s27 + $0x65] sm:$0xff]  ;;  %v2444_v37 = vld [vmem:[%s4420_s27 + $0x75] sm:$0xff]  ;;  %v2445_v62 = vld [vmem:[%s4420_s27 + $0x7d] sm:$0xff] }
  0x9a   : > { %v836_v39 = vld [vmem:[%s4420_s27 + $0x102] sm:$0xff] }
  0x9b   : > { %v2764_v19 = vld [vmem:[%s4420_s27 + $0x46] sm:$0xff] }
  0x9f   : > { %3732 = vmatmul.mubr.msk.bf16.gmra.mrb[32].mxu1 %vm334_vm1, %v276_v35  ;;  %3902 = vmatmul.mubr.msk.bf16.gmra.mrb[12].mxu0 %vm334_vm1, %v4577_v1  ;;  %v810_v1 = vld [vmem:[%s4420_s27 + $0x32] sm:$0xff]  ;;  %v2474_v35 = vpack.c.bf16 %v2443_v40, %v2442_v26  ;;  %v2798_v40 = vpack.c.bf16 %v2765_v31, %v2764_v19  ;;  %v1490_v19 = vld [vmem:[%s4420_s27 + $0x123] sm:$0xff] }
  0xa0   : > { %3737 = vmatprep.mubr.msk.bf16.mxu1 %vm334_vm1, %v840_v36  ;;  %3905 = vmatprep.mubr.msk.bf16.mxu0 %vm334_vm1, %v4593_v12  ;;  %v811_v12 = vld [vmem:[%s4420_s27 + $0x3a] sm:$0xff]  ;;  %v834_v36 = vld [vmem:[%s4420_s27 + $0xf2] sm:$0xff] }
  0xa1   : > { %v4753_v47 = vpack.c.bf16 %v811_v12, %v810_v1  ;;  %v2446_v1 = vld [vmem:[%s4420_s27 + $0x85] sm:$0xff]  ;;  %v2447_v12 = vld [vmem:[%s4420_s27 + $0x8d] sm:$0xff] }
  0xa2   : > { %v1491_v31 = vld [vmem:[%s4420_s27 + $0x12b] sm:$0xff] }
  0xa7   : > { %3738 = vmatmul.mubr.msk.bf16.vlgmr.msra.gmra.mrb[0].mxu1 %vm334_vm1, %v4733_v41  ;;  %3906 = vmatmul.mubr.msk.bf16.gmra.mrb[16].mxu0 %vm334_vm1, %v4595_v14  ;;  %v4755_v14 = vpack.c.bf16 %v813_v46, %v812_v16  ;;  %v4861_v16 = vpack.c.bf16 %v835_v52, %v834_v36  ;;  %v2475_v46 = vpack.c.bf16 %v2445_v62, %v2444_v37  ;;  %v2772_v37 = vld [vmem:[%s4420_s27 + $0x86] sm:$0xff]  ;;  %v2773_v62 = vld [vmem:[%s4420_s27 + $0x8e] sm:$0xff] }
  0xa8   : > { %3741 = vmatprep.mubr.msk.bf16.mxu1 %vm334_vm1, %v4735_v42  ;;  %3909 = vmatprep.mubr.msk.bf16.mxu0 %vm334_vm1, %v4620_v30  ;;  %v814_v30 = vld [vmem:[%s4420_s27 + $0x52] sm:$0xff] }
  0xa9   : > { %3774 = vmatpush3.bf16.msra.mxu1 %v1241_v44  ;;  %v4769_v51 = vpack.c.bf16 %v815_v48, %v814_v30  ;;  %v837_v44 = vld [vmem:[%s4420_s27 + $0x10a] sm:$0xff]  ;;  %v2476_v48 = vpack.c.bf16 %v2447_v12, %v2446_v1  ;;  %v2774_v12 = vld [vmem:[%s4420_s27 + $0x96] sm:$0xff] }
  0xaa   : > { %4296 = vmatprep.subr.msk.bf16.mxu1 %vm389_vm0, %v4392_v0  ;;  %v816_v0 = vld [vmem:[%s4420_s27 + $0x62] sm:$0xff]  ;;  %v4863_v30 = vpack.c.bf16 %v837_v44, %v836_v39  ;;  %v2802_v44 = vpack.c.bf16 %v2773_v62, %v2772_v37  ;;  %v1165_v1 = vld [vmem:[%s4420_s27 + $0x12a] sm:$0xff] }
  0xab   : > { %v4771_v53 = vpack.c.bf16 %v817_v49, %v816_v0  ;;  %v838_v0 = vld [vmem:[%s4420_s27 + $0x112] sm:$0xff]  ;;  %v839_v49 = vld [vmem:[%s4420_s27 + $0x11a] sm:$0xff] }
  0xaf   : > { %3742 = vmatmul.mubr.msk.bf16.gmra.mrb[4].mxu1 %vm334_vm1, %v4753_v47  ;;  %3910 = vmatmul.mubr.msk.bf16.gmra.mrb[20].mxu0 %vm334_vm1, %v4622_v32  ;;  %v818_v32 = vld [vmem:[%s4420_s27 + $0x72] sm:$0xff] }
  0xb0   : > { %3745 = vmatprep.mubr.msk.bf16.mxu1 %vm334_vm1, %v4755_v14  ;;  %3913 = vmatprep.mubr.msk.bf16.mxu0 %vm334_vm1, %v4638_v43  ;;  %v819_v43 = vld [vmem:[%s4420_s27 + $0x7a] sm:$0xff] }
  0xb1   : > { %v4785_v56 = vpack.c.bf16 %v819_v43, %v818_v32  ;;  %v2448_v32 = vld [vmem:[%s4420_s27 + $0x95] sm:$0xff]  ;;  %v2449_v43 = vld [vmem:[%s4420_s27 + $0x9d] sm:$0xff] }
  0xb7   : > { %3746 = vmatmul.mubr.msk.bf16.gmra.mrb[8].mxu1 %vm334_vm1, %v4769_v51  ;;  %3914 = vmatmul.mubr.msk.bf16.gmra.mrb[24].mxu0 %vm334_vm1, %v4640_v45  ;;  %v822_v45 = vld [vmem:[%s4420_s27 + $0x92] sm:$0xff] }
  0xb8   : > { %3749 = vmatprep.mubr.msk.bf16.mxu1 %vm334_vm1, %v4771_v53  ;;  %3917 = vmatprep.mubr.msk.bf16.mxu0 %vm334_vm1, %v4656_v57  ;;  %v2142_v57 = vld [vmem:[%s4420_s27 + $0x134] sm:$0xff]  ;;  %v4805_v5 = vpack.c.bf16 %v823_v60, %v822_v45  ;;  %v4877_v45 = vpack.c.bf16 %v839_v49, %v838_v0  ;;  %v2477_v60 = vpack.c.bf16 %v2449_v43, %v2448_v32 }
  0xb9   : > { %v2161_v6 = vpack.c.bf16 %v2143_v61, %v2142_v57  ;;  %v2478_v57 = vpack.c.bf16 %v2451_v55, %v2450_v54  ;;  %v2452_v61 = vld [vmem:[%s4420_s27 + $0xb5] sm:$0xff]  ;;  %v1478_v55 = vld [vmem:[%s4420_s27 + $0xc3] sm:$0xff] }
  0xba   : > { %v2777_v0 = vld [vmem:[%s4420_s27 + $0xae] sm:$0xff] }
  0xbf   : > { %3750 = vmatmul.mubr.msk.bf16.gmra.mrb[12].mxu1 %vm334_vm1, %v4785_v56  ;;  %3918 = vmatmul.mubr.msk.bf16.gmra.mrb[28].mxu0 %vm334_vm1, %v4658_v59  ;;  %v2435_v59 = vld [vmem:[%s4420_s27 + $0x2d] sm:$0xff] }
  0xc0   : > { %3753 = vmatprep.mubr.msk.bf16.mxu1 %vm334_vm1, %v4787_v58  ;;  %3921 = vmatprep.mubr.msk.bf16.mxu0 %vm334_vm1, %v4672_v7  ;;  %v2470_v9 = vpack.c.bf16 %v2435_v59, %v2434_v4  ;;  %v826_v7 = vld [vmem:[%s4420_s27 + $0xb2] sm:$0xff]  ;;  %v2479_v59 = vpack.c.bf16 %v2453_v63, %v2452_v61  ;;  %v1481_v63 = vld [vmem:[%s4420_s27 + $0xdb] sm:$0xff] }
  0xc1   : > { %v4823_v27 = vpack.c.bf16 %v827_v10, %v826_v7  ;;  %v2455_v4 = vld [vmem:[%s4420_s27 + $0xcd] sm:$0xff]  ;;  %v2458_v7 = vld [vmem:[%s4420_s27 + $0xe5] sm:$0xff] }
  0xc2   : > { %v2459_v10 = vld [vmem:[%s4420_s27 + $0xed] sm:$0xff] }
  0xc3   : > { %v2482_v13 = vpack.c.bf16 %v2459_v10, %v2458_v7  ;;  %v1480_v61 = vld [vmem:[%s4420_s27 + $0xd3] sm:$0xff]  ;;  %v1482_v7 = vld [vmem:[%s4420_s27 + $0xe3] sm:$0xff]  ;;  %v1483_v10 = vld [vmem:[%s4420_s27 + $0xeb] sm:$0xff] }
  0xc7   : > { %3754 = vmatmul.mubr.msk.bf16.gmra.mrb[16].mxu1 %vm334_vm1, %v4805_v5  ;;  %3922 = vmatmul.mubr.msk.bf16.gmra.mrb[32].mxu0 %vm334_vm1, %v2161_v6  ;;  %v2480_v6 = vpack.c.bf16 %v2455_v4, %v2454_v3  ;;  %v2780_v3 = vld [vmem:[%s4420_s27 + $0xc6] sm:$0xff]  ;;  %v2781_v4 = vld [vmem:[%s4420_s27 + $0xce] sm:$0xff] }
  0xc8   : > { %3757 = vmatprep.mubr.msk.bf16.mxu1 %vm334_vm1, %v4807_v8  ;;  %3927 = vmatprep.mubr.msk.bf16.mxu0 %vm334_vm1, %v2470_v9  ;;  %v2457_v9 = vld [vmem:[%s4420_s27 + $0xdd] sm:$0xff] }
  0xcf   : > { %3758 = vmatmul.mubr.msk.bf16.gmra.mrb[20].mxu1 %vm334_vm1, %v4823_v27  ;;  %3928 = vmatmul.mubr.msk.bf16.vlgmr.msra.gmra.mrb[0].mxu0 %vm334_vm1, %v2471_v29  ;;  %v2467_v29 = vld [vmem:[%s4420_s27 + $0x12d] sm:$0xff] }
  0xd0   : > { %3761 = vmatprep.mubr.msk.bf16.mxu1 %vm334_vm1, %v4825_v20  ;;  %3964 = vmatpush3.bf16.msra.mxu0 %v2871_v22  ;;  %v2486_v22 = vpack.c.bf16 %v2467_v29, %v2466_v23  ;;  %v1486_v23 = vld [vmem:[%s4420_s27 + $0x103] sm:$0xff]  ;;  %v1487_v29 = vld [vmem:[%s4420_s27 + $0x10b] sm:$0xff] }
  0xd1   : > { %3931 = vmatprep.mubr.msk.bf16.mxu0 %vm334_vm1, %v2472_v21 }
  0xd7   : > { %3762 = vmatmul.mubr.msk.bf16.gmra.mrb[24].mxu1 %vm334_vm1, %v4843_v33  ;;  %3932 = vmatmul.mubr.msk.bf16.gmra.mrb[4].mxu0 %vm334_vm1, %v2473_v50  ;;  %v2768_v50 = vld [vmem:[%s4420_s27 + $0x66] sm:$0xff] }
  0xd8   : > { %3765 = vmatprep.mubr.msk.bf16.mxu1 %vm334_vm1, %v4845_v34  ;;  %3935 = vmatprep.mubr.msk.bf16.mxu0 %vm334_vm1, %v2474_v35  ;;  %v2769_v35 = vld [vmem:[%s4420_s27 + $0x6e] sm:$0xff] }
  0xd9   : > { %v2800_v52 = vpack.c.bf16 %v2769_v35, %v2768_v50  ;;  %v1509_v50 = vpack.c.bf16 %v1491_v31, %v1490_v19 }
  0xdf   : > { %3766 = vmatmul.mubr.msk.bf16.gmra.mrb[28].mxu1 %vm334_vm1, %v4861_v16  ;;  %3936 = vmatmul.mubr.msk.bf16.gmra.mrb[8].mxu0 %vm334_vm1, %v2475_v46  ;;  %v1476_v46 = vld [vmem:[%s4420_s27 + $0xb3] sm:$0xff] }
  0xe0   : > { %3769 = vmatprep.mubr.msk.bf16.mxu1 %vm334_vm1, %v4863_v30  ;;  %3939 = vmatprep.mubr.msk.bf16.mxu0 %vm334_vm1, %v2476_v48  ;;  %v1477_v48 = vld [vmem:[%s4420_s27 + $0xbb] sm:$0xff] }
  0xe1   : > { %v1502_v43 = vpack.c.bf16 %v1477_v48, %v1476_v46 }
  0xe7   : > { %3770 = vmatmul.mubr.msk.bf16.gmra.mrb[32].mxu1 %vm334_vm1, %v4877_v45  ;;  %3940 = vmatmul.mubr.msk.bf16.gmra.mrb[12].mxu0 %vm334_vm1, %v2477_v60  ;;  %v2778_v60 = vld [vmem:[%s4420_s27 + $0xb6] sm:$0xff] }
  0xe8   : > { %3775 = vmatprep.mubr.msk.bf16.mxu1 %vm334_vm1, %v4733_v41  ;;  %3943 = vmatprep.mubr.msk.bf16.mxu0 %vm334_vm1, %v2478_v57  ;;  %v2456_v41 = vld [vmem:[%s4420_s27 + $0xd5] sm:$0xff]  ;;  %v2779_v57 = vld [vmem:[%s4420_s27 + $0xbe] sm:$0xff] }
  0xe9   : > { %v2481_v11 = vpack.c.bf16 %v2457_v9, %v2456_v41  ;;  %v1504_v41 = vpack.c.bf16 %v1481_v63, %v1480_v61  ;;  %v2806_v9 = vpack.c.bf16 %v2781_v4, %v2780_v3  ;;  %v5046_v63 = vld [vmem:[%s5144_s2] ss:$0 sm:$0xff] }
  0xef   : > { %3776 = vmatmul.mubr.msk.bf16.vlgmr.msra.gmra.mrb[0].mxu1 %vm334_vm1, %v4735_v42  ;;  %3944 = vmatmul.mubr.msk.bf16.gmra.mrb[16].mxu0 %vm334_vm1, %v2479_v59  ;;  %v2461_v42 = vld [vmem:[%s4420_s27 + $0xfd] sm:$0xff] }
  0xf0   : > { %3779 = vmatprep.mubr.msk.bf16.mxu1 %vm334_vm1, %v4753_v47  ;;  %3947 = vmatprep.mubr.msk.bf16.mxu0 %vm334_vm1, %v2480_v6  ;;  %v2462_v47 = vld [vmem:[%s4420_s27 + $0x105] sm:$0xff]  ;;  %v2805_v6 = vpack.c.bf16 %v2779_v57, %v2778_v60 }
  0xf1   : > { %4002 = vmatpush3.bf16.msra.mxu1 %v4402_v2  ;;  %v2460_v2 = vld [vmem:[%s4420_s27 + $0xf5] sm:$0xff]  ;;  %v2484_v18 = vpack.c.bf16 %v2463_v15, %v2462_v47  ;;  %v2784_v47 = vld [vmem:[%s4420_s27 + $0xe6] sm:$0xff] }
  0xf2   : > { %v2483_v17 = vpack.c.bf16 %v2461_v42, %v2460_v2  ;;  %v1484_v2 = vld [vmem:[%s4420_s27 + $0xf3] sm:$0xff]  ;;  %v1485_v42 = vld [vmem:[%s4420_s27 + $0xfb] sm:$0xff] }
  0xf3   : > { %v2785_v15 = vld [vmem:[%s4420_s27 + $0xee] sm:$0xff] }
  0xf7   : > { %3780 = vmatmul.mubr.msk.bf16.gmra.mrb[4].mxu1 %vm334_vm1, %v4755_v14  ;;  %3948 = vmatmul.mubr.msk.bf16.gmra.mrb[20].mxu0 %vm334_vm1, %v2481_v11  ;;  %v2464_v14 = vld [vmem:[%s4420_s27 + $0x115] sm:$0xff] }
  0xf8   : > { %3783 = vmatprep.mubr.msk.bf16.mxu1 %vm334_vm1, %v4769_v51  ;;  %3951 = vmatprep.mubr.msk.bf16.mxu0 %vm334_vm1, %v2482_v13  ;;  %v2465_v51 = vld [vmem:[%s4420_s27 + $0x11d] sm:$0xff] }
  0xf9   : > { %v2485_v21 = vpack.c.bf16 %v2465_v51, %v2464_v14  ;;  %v2782_v11 = vld [vmem:[%s4420_s27 + $0xd6] sm:$0xff]  ;;  %v2783_v13 = vld [vmem:[%s4420_s27 + $0xde] sm:$0xff]  ;;  %v1506_v14 = vpack.c.bf16 %v1485_v42, %v1484_v2  ;;  %v2808_v51 = vpack.c.bf16 %v2785_v15, %v2784_v47 }
  0xff   : > { %3784 = vmatmul.mubr.msk.bf16.gmra.mrb[8].mxu1 %vm334_vm1, %v4771_v53  ;;  %3952 = vmatmul.mubr.msk.bf16.gmra.mrb[24].mxu0 %vm334_vm1, %v2483_v17  ;;  %v2468_v53 = vld [vmem:[%s4420_s27 + $0x135] sm:$0xff]  ;;  %v1505_v17 = vpack.c.bf16 %v1483_v10, %v1482_v7 }
 0x100   : > { %3787 = vmatprep.mubr.msk.bf16.mxu1 %vm334_vm1, %v4785_v56  ;;  %3955 = vmatprep.mubr.msk.bf16.mxu0 %vm334_vm1, %v2484_v18  ;;  %v2469_v56 = vld [vmem:[%s4420_s27 + $0x13d] sm:$0xff]  ;;  %v2807_v18 = vpack.c.bf16 %v2783_v13, %v2782_v11 }
 0x101   : > { %v2487_v24 = vpack.c.bf16 %v2469_v56, %v2468_v53  ;;  %v1488_v53 = vld [vmem:[%s4420_s27 + $0x113] sm:$0xff]  ;;  %v1489_v56 = vld [vmem:[%s4420_s27 + $0x11b] sm:$0xff] }
 0x107   : > { %3788 = vmatmul.mubr.msk.bf16.gmra.mrb[12].mxu1 %vm334_vm1, %v4787_v58  ;;  %3956 = vmatmul.mubr.msk.bf16.gmra.mrb[28].mxu0 %vm334_vm1, %v2485_v21  ;;  %v2762_v58 = vld [vmem:[%s4420_s27 + $0x36] sm:$0xff] }
 0x108   : > { %3791 = vmatprep.mubr.msk.bf16.mxu1 %vm334_vm1, %v4805_v5  ;;  %3959 = vmatprep.mubr.msk.bf16.mxu0 %vm334_vm1, %v2486_v22  ;;  %v2763_v5 = vld [vmem:[%s4420_s27 + $0x3e] sm:$0xff]  ;;  %v2786_v21 = vld [vmem:[%s4420_s27 + $0xf6] sm:$0xff] }
 0x109   : > { %v2797_v26 = vpack.c.bf16 %v2763_v5, %v2762_v58  ;;  %v2787_v22 = vld [vmem:[%s4420_s27 + $0xfe] sm:$0xff]  ;;  %v1508_v58 = vpack.c.bf16 %v1489_v56, %v1488_v53  ;;  %v2810_v5 = vpack.c.bf16 %v2789_v38, %v2788_v25 }
 0x10f   : > { %3792 = vmatmul.mubr.msk.bf16.gmra.mrb[16].mxu1 %vm334_vm1, %v4807_v8  ;;  %3960 = vmatmul.mubr.msk.bf16.gmra.mrb[32].mxu0 %vm334_vm1, %v2487_v24  ;;  %v2766_v8 = vld [vmem:[%s4420_s27 + $0x56] sm:$0xff]  ;;  %v1507_v24 = vpack.c.bf16 %v1487_v29, %v1486_v23 }
 0x110   : > { %3795 = vmatprep.mubr.msk.bf16.mxu1 %vm334_vm1, %v4823_v27  ;;  %3965 = vmatprep.mubr.msk.bf16.mxu0 %vm334_vm1, %v2796_v28  ;;  %v2767_v27 = vld [vmem:[%s4420_s27 + $0x5e] sm:$0xff]  ;;  %v2809_v28 = vpack.c.bf16 %v2787_v22, %v2786_v21 }
 0x111   : > { %v2799_v36 = vpack.c.bf16 %v2767_v27, %v2766_v8  ;;  %v2792_v8 = vld [vmem:[%s4420_s27 + $0x126] sm:$0xff]  ;;  %v2793_v27 = vld [vmem:[%s4420_s27 + $0x12e] sm:$0xff] }
 0x117   : > { %3796 = vmatmul.mubr.msk.bf16.gmra.mrb[20].mxu1 %vm334_vm1, %v4825_v20  ;;  %3966 = vmatmul.mubr.msk.bf16.vlgmr.msra.gmra.mrb[0].mxu0 %vm334_vm1, %v2797_v26  ;;  %v2770_v20 = vld [vmem:[%s4420_s27 + $0x76] sm:$0xff] }
 0x118   : > { %3799 = vmatprep.mubr.msk.bf16.mxu1 %vm334_vm1, %v4843_v33  ;;  %3969 = vmatprep.mubr.msk.bf16.mxu0 %vm334_vm1, %v2798_v40  ;;  %v2771_v33 = vld [vmem:[%s4420_s27 + $0x7e] sm:$0xff]  ;;  %v2790_v26 = vld [vmem:[%s4420_s27 + $0x116] sm:$0xff] }
 0x119   : > { %v2801_v39 = vpack.c.bf16 %v2771_v33, %v2770_v20  ;;  %v2791_v40 = vld [vmem:[%s4420_s27 + $0x11e] sm:$0xff] }
 0x11a   : > { %v2811_v35 = vpack.c.bf16 %v2791_v40, %v2790_v26  ;;  %v2795_v20 = vld [vmem:[%s4420_s27 + $0x13e] sm:$0xff] }
 0x11f   : > { %3800 = vmatmul.mubr.msk.bf16.gmra.mrb[24].mxu1 %vm334_vm1, %v4845_v34  ;;  %3970 = vmatmul.mubr.msk.bf16.gmra.mrb[4].mxu0 %vm334_vm1, %v2799_v36  ;;  %v1164_v34 = vld [vmem:[%s4420_s27 + $0x122] sm:$0xff]  ;;  %v2812_v36 = vpack.c.bf16 %v2793_v27, %v2792_v8 }
 0x120   : > { %3803 = vmatprep.mubr.msk.bf16.mxu1 %vm334_vm1, %v4861_v16  ;;  %3973 = vmatprep.mubr.msk.bf16.mxu0 %vm334_vm1, %v2800_v52  ;;  %v2775_v16 = vld [vmem:[%s4420_s27 + $0x9e] sm:$0xff]  ;;  %v1183_v49 = vpack.c.bf16 %v1165_v1, %v1164_v34  ;;  %v2794_v52 = vld [vmem:[%s4420_s27 + $0x136] sm:$0xff] }
 0x121   : > { %v2803_v32 = vpack.c.bf16 %v2775_v16, %v2774_v12  ;;  %v2813_v33 = vpack.c.bf16 %v2795_v20, %v2794_v52 }
 0x127   : > { %3804 = vmatmul.mubr.msk.bf16.gmra.mrb[28].mxu1 %vm334_vm1, %v4863_v30  ;;  %3974 = vmatmul.mubr.msk.bf16.gmra.mrb[8].mxu0 %vm334_vm1, %v2801_v39  ;;  %v2776_v30 = vld [vmem:[%s4420_s27 + $0xa6] sm:$0xff] }
 0x128   : > { %3807 = vmatprep.mubr.msk.bf16.mxu1 %vm334_vm1, %v4877_v45  ;;  %3977 = vmatprep.mubr.msk.bf16.mxu0 %vm334_vm1, %v2802_v44  ;;  %v2804_v54 = vpack.c.bf16 %v2777_v0, %v2776_v30  ;;  %v1479_v45 = vld [vmem:[%s4420_s27 + $0xcb] sm:$0xff] }
 0x129   : > { %v1503_v59 = vpack.c.bf16 %v1479_v45, %v1478_v55 }
 0x12f   : > { %3808 = vmatmul.mubr.msk.bf16.gmra.mrb[32].mxu1 %vm334_vm1, %v1183_v49  ;;  %3978 = vmatmul.mubr.msk.bf16.gmra.mrb[12].mxu0 %vm334_vm1, %v2803_v32 }
 0x130   : > { %3833 = vmatprep.mubr.msk.bf16.mxu1 %vm334_vm1, %v1502_v43  ;;  %3981 = vmatprep.mubr.msk.bf16.mxu0 %vm334_vm1, %v2804_v54 }
 0x137   : > { %3834 = vmatmul.mubr.msk.bf16.vlgmr.msra.gmra.mrb[20].mxu1 %vm334_vm1, %v1503_v59  ;;  %3982 = vmatmul.mubr.msk.bf16.gmra.mrb[16].mxu0 %vm334_vm1, %v2805_v6 }
 0x138   : > { %3837 = vmatprep.mubr.msk.bf16.mxu1 %vm334_vm1, %v1504_v41  ;;  %3985 = vmatprep.mubr.msk.bf16.mxu0 %vm334_vm1, %v2806_v9 }
 0x13f   : > { %3838 = vmatmul.mubr.msk.bf16.gmra.mrb[24].mxu1 %vm334_vm1, %v1505_v17  ;;  %3986 = vmatmul.mubr.msk.bf16.gmra.mrb[20].mxu0 %vm334_vm1, %v2807_v18 }
 0x140   : > { %3841 = vmatprep.mubr.msk.bf16.mxu1 %vm334_vm1, %v1506_v14  ;;  %3989 = vmatprep.mubr.msk.bf16.mxu0 %vm334_vm1, %v2808_v51 }
 0x147   : > { %3842 = vmatmul.mubr.msk.bf16.gmra.mrb[28].mxu1 %vm334_vm1, %v1507_v24  ;;  %3990 = vmatmul.mubr.msk.bf16.gmra.mrb[24].mxu0 %vm334_vm1, %v2809_v28 }
 0x148   : > { %3845 = vmatprep.mubr.msk.bf16.mxu1 %vm334_vm1, %v1508_v58  ;;  %3993 = vmatprep.mubr.msk.bf16.mxu0 %vm334_vm1, %v2810_v5 }
 0x14f   : > { %3846 = vmatmul.mubr.msk.bf16.gmra.mrb[32].mxu1 %vm334_vm1, %v1509_v50  ;;  %3994 = vmatmul.mubr.msk.bf16.gmra.mrb[28].mxu0 %vm334_vm1, %v2811_v35 }
 0x150   : > { %3997 = vmatprep.mubr.msk.bf16.mxu0 %vm334_vm1, %v2812_v36 }
 0x157   : > { %3998 = vmatmul.mubr.msk.bf16.gmra.mrb[32].mxu0 %vm334_vm1, %v2813_v33 }
 0x1c2   : > { %v3777_v37 = vpop.f32.mrb[0].mxu1 }
 0x1c3   : > { %v1277_v62 = vpop.f32.mrb[1].mxu1 }
 0x1c4   : > { %v3778_v39 = vpop.f32.mrb[2].mxu1 }
 0x1c5   : > { %v1280_v44 = vpop.f32.mrb[3].mxu1 }
 0x1ca   : > { %v3781_v34 = vpop.f32.mrb[4].mxu1 }
 0x1cb   : > { %v1293_v1 = vpop.f32.mrb[5].mxu1 }
 0x1cc   : > { %v3782_v12 = vpop.f32.mrb[6].mxu1 }
 0x1cd   : > { %v1296_v16 = vpop.f32.mrb[7].mxu1 }
 0x1d2   : > { %v3785_v46 = vpop.f32.mrb[8].mxu1 }
 0x1d3   : > { %v1309_v48 = vpop.f32.mrb[9].mxu1 }
 0x1d4   : > { %v3786_v30 = vpop.f32.mrb[10].mxu1 }
 0x1d5   : > { %v1312_v0 = vpop.f32.mrb[11].mxu1 }
 0x1da   : > { %v5026_v49 = vpop.f32.mrb[12].mxu1 }
 0x1db   : > { %v5028_v32 = vpop.f32.mrb[13].mxu1 }
 0x1dc   : > { %v5030_v43 = vpop.f32.mrb[14].mxu1 }
 0x1dd   : > { %v5032_v54 = vpop.f32.mrb[15].mxu1 }
 0x1e2   : > { %v5034_v55 = vpop.f32.mrb[16].mxu1 }
 0x1e3   : > { %v5036_v45 = vpop.f32.mrb[17].mxu1 }
 0x1e4   : > { %v5038_v60 = vpop.f32.mrb[18].mxu1 }
 0x1e5   : > { %v5040_v57 = vpop.f32.mrb[19].mxu1 }
 0x1ea   : > { %v3967_v61 = vpop.f32.mrb[0].mxu0 }
 0x1eb   : > { %v4003_v3 = vadd.f32 %v3967_v61, %v3777_v37  ;;  %v2907_v4 = vpop.f32.mrb[1].mxu0 }
 0x1ec   : > { %v4004_v59 = vadd.f32 %v2907_v4, %v1277_v62  ;;  %v3968_v6 = vpop.f32.mrb[2].mxu0 }
 0x1ed   : > { %v3095_v41 = vadd.f32 %v4003_v3, %v5046_v63  ;;  %v4005_v9 = vadd.f32 %v3968_v6, %v3778_v39  ;;  %v2910_v7 = vpop.f32.mrb[3].mxu0 }
 0x1ee   : > { %v3093_v10 = vadd.f32 %v4004_v59, %v5046_v63  ;;  %v4006_v11 = vadd.f32 %v2910_v7, %v1280_v44 }
 0x1ef   : > { %v3131_v13 = vmax.f32 %v3095_v41, 0.0  ;;  %v3096_v2 = vadd.f32 %v4005_v9, %v5046_v63 }
 0x1f0   : > { %v3129_v42 = vmax.f32 %v3093_v10, 0.0  ;;  %v3094_v47 = vadd.f32 %v4006_v11, %v5046_v63 }
 0x1f1   : > { %3167 = vst [vmem:[%s5052_s20 + $0x10] sm:$0xff] %v3131_v13  ;;  %v3132_v15 = vmax.f32 %v3096_v2, 0.0 }
 0x1f2   : > { %3165 = vst [vmem:[%s5052_s20] sm:$0xff] %v3129_v42  ;;  %v3130_v17 = vmax.f32 %v3094_v47, 0.0  ;;  %v3971_v18 = vpop.f32.mrb[4].mxu0 }
 0x1f3   : > { %3168 = vst [vmem:[%s5052_s20 + $0x18] sm:$0xff] %v3132_v15  ;;  %v4007_v14 = vadd.f32 %v3971_v18, %v3781_v34  ;;  %v2923_v51 = vpop.f32.mrb[5].mxu0 }
 0x1f4   : > { %3166 = vst [vmem:[%s5052_s20 + $0x8] sm:$0xff] %v3130_v17  ;;  %v4008_v23 = vadd.f32 %v2923_v51, %v1293_v1  ;;  %v3972_v29 = vpop.f32.mrb[6].mxu0 }
 0x1f5   : > { %v3099_v21 = vadd.f32 %v4007_v14, %v5046_v63  ;;  %v4009_v22 = vadd.f32 %v3972_v29, %v3782_v12  ;;  %v2926_v53 = vpop.f32.mrb[7].mxu0 }
 0x1f6   : > { %v3097_v56 = vadd.f32 %v4008_v23, %v5046_v63  ;;  %v4010_v25 = vadd.f32 %v2926_v53, %v1296_v16 }
 0x1f7   : > { %v3135_v38 = vmax.f32 %v3099_v21, 0.0  ;;  %v3100_v24 = vadd.f32 %v4009_v22, %v5046_v63 }
 0x1f8   : > { %v3133_v28 = vmax.f32 %v3097_v56, 0.0  ;;  %v3098_v58 = vadd.f32 %v4010_v25, %v5046_v63 }
 0x1f9   : > { %3171 = vst [vmem:[%s5052_s20 + $0x30] sm:$0xff] %v3135_v38  ;;  %v3136_v5 = vmax.f32 %v3100_v24, 0.0 }
 0x1fa   : > { %3169 = vst [vmem:[%s5052_s20 + $0x20] sm:$0xff] %v3133_v28  ;;  %v3134_v19 = vmax.f32 %v3098_v58, 0.0  ;;  %v3975_v31 = vpop.f32.mrb[8].mxu0 }
 0x1fb   : > { %3172 = vst [vmem:[%s5052_s20 + $0x38] sm:$0xff] %v3136_v5  ;;  %v4011_v26 = vadd.f32 %v3975_v31, %v3785_v46  ;;  %v2939_v40 = vpop.f32.mrb[9].mxu0 }
 0x1fc   : > { %3170 = vst [vmem:[%s5052_s20 + $0x28] sm:$0xff] %v3134_v19  ;;  %v4012_v8 = vadd.f32 %v2939_v40, %v1309_v48  ;;  %v3976_v27 = vpop.f32.mrb[10].mxu0 }
 0x1fd   : > { %v3103_v50 = vadd.f32 %v4011_v26, %v5046_v63  ;;  %v4013_v35 = vadd.f32 %v3976_v27, %v3786_v30  ;;  %v2942_v36 = vpop.f32.mrb[11].mxu0 }
 0x1fe   : > { %v3101_v52 = vadd.f32 %v4012_v8, %v5046_v63  ;;  %v4014_v20 = vadd.f32 %v2942_v36, %v1312_v0 }
 0x1ff   : > { %v3139_v33 = vmax.f32 %v3103_v50, 0.0  ;;  %v3104_v37 = vadd.f32 %v4013_v35, %v5046_v63 }
 0x200   : > { %v3137_v62 = vmax.f32 %v3101_v52, 0.0  ;;  %v3102_v39 = vadd.f32 %v4014_v20, %v5046_v63 }
 0x201   : > { %3175 = vst [vmem:[%s5052_s20 + $0x50] sm:$0xff] %v3139_v33  ;;  %v3140_v44 = vmax.f32 %v3104_v37, 0.0 }
 0x202   : > { %3173 = vst [vmem:[%s5052_s20 + $0x40] sm:$0xff] %v3137_v62  ;;  %v3138_v34 = vmax.f32 %v3102_v39, 0.0  ;;  %v3979_v1 = vpop.f32.mrb[12].mxu0 }
 0x203   : > { %3176 = vst [vmem:[%s5052_s20 + $0x58] sm:$0xff] %v3140_v44  ;;  %v4015_v12 = vadd.f32 %v3979_v1, %v5026_v49  ;;  %v2955_v16 = vpop.f32.mrb[13].mxu0 }
 0x204   : > { %3174 = vst [vmem:[%s5052_s20 + $0x48] sm:$0xff] %v3138_v34  ;;  %v4016_v46 = vadd.f32 %v2955_v16, %v5028_v32  ;;  %v3980_v48 = vpop.f32.mrb[14].mxu0 }
 0x205   : > { %v3107_v30 = vadd.f32 %v4015_v12, %v5046_v63  ;;  %v4017_v0 = vadd.f32 %v3980_v48, %v5030_v43  ;;  %v2958_v61 = vpop.f32.mrb[15].mxu0 }
 0x206   : > { %v3105_v3 = vadd.f32 %v4016_v46, %v5046_v63  ;;  %v4018_v4 = vadd.f32 %v2958_v61, %v5032_v54 }
 0x207   : > { %v3143_v59 = vmax.f32 %v3107_v30, 0.0  ;;  %v3108_v49 = vadd.f32 %v4017_v0, %v5046_v63 }
 0x208   : > { %v3141_v6 = vmax.f32 %v3105_v3, 0.0  ;;  %v3106_v41 = vadd.f32 %v4018_v4, %v5046_v63 }
 0x209   : > { %3179 = vst [vmem:[%s5052_s20 + $0x70] sm:$0xff] %v3143_v59  ;;  %v3144_v32 = vmax.f32 %v3108_v49, 0.0 }
 0x20a   : > { %v3835_v9 = vpop.f32.mrb[20].mxu1  ;;  %3177 = vst [vmem:[%s5052_s20 + $0x60] sm:$0xff] %v3141_v6  ;;  %v3142_v7 = vmax.f32 %v3106_v41, 0.0  ;;  %v3983_v10 = vpop.f32.mrb[16].mxu0 }
 0x20b   : > { %v1683_v11 = vpop.f32.mrb[21].mxu1  ;;  %3180 = vst [vmem:[%s5052_s20 + $0x78] sm:$0xff] %v3144_v32  ;;  %v4019_v43 = vadd.f32 %v3983_v10, %v5034_v55  ;;  %v2971_v13 = vpop.f32.mrb[17].mxu0 }
 0x20c   : > { %v3836_v54 = vpop.f32.mrb[22].mxu1  ;;  %3178 = vst [vmem:[%s5052_s20 + $0x68] sm:$0xff] %v3142_v7  ;;  %v4020_v2 = vadd.f32 %v2971_v13, %v5036_v45  ;;  %v3984_v42 = vpop.f32.mrb[18].mxu0 }
 0x20d   : > { %v1686_v47 = vpop.f32.mrb[23].mxu1  ;;  %v3111_v15 = vadd.f32 %v4019_v43, %v5046_v63  ;;  %v4021_v17 = vadd.f32 %v3984_v42, %v5038_v60  ;;  %v2974_v18 = vpop.f32.mrb[19].mxu0 }
 0x20e   : > { %v3109_v14 = vadd.f32 %v4020_v2, %v5046_v63  ;;  %v4022_v51 = vadd.f32 %v2974_v18, %v5040_v57 }
 0x20f   : > { %v3147_v55 = vmax.f32 %v3111_v15, 0.0  ;;  %v3112_v23 = vadd.f32 %v4021_v17, %v5046_v63 }
 0x210   : > { %v3145_v29 = vmax.f32 %v3109_v14, 0.0  ;;  %v3110_v21 = vadd.f32 %v4022_v51, %v5046_v63 }
 0x211   : > { %3183 = vst [vmem:[%s5052_s20 + $0x90] sm:$0xff] %v3147_v55  ;;  %v3148_v45 = vmax.f32 %v3112_v23, 0.0 }
 0x212   : > { %v3839_v22 = vpop.f32.mrb[24].mxu1  ;;  %3181 = vst [vmem:[%s5052_s20 + $0x80] sm:$0xff] %v3145_v29  ;;  %v3146_v53 = vmax.f32 %v3110_v21, 0.0  ;;  %v3987_v56 = vpop.f32.mrb[20].mxu0 }
 0x213   : > { %v1699_v25 = vpop.f32.mrb[25].mxu1  ;;  %3184 = vst [vmem:[%s5052_s20 + $0x98] sm:$0xff] %v3148_v45  ;;  %v4023_v60 = vadd.f32 %v3987_v56, %v3835_v9  ;;  %v2987_v38 = vpop.f32.mrb[21].mxu0 }
 0x214   : > { %v3840_v24 = vpop.f32.mrb[26].mxu1  ;;  %3182 = vst [vmem:[%s5052_s20 + $0x88] sm:$0xff] %v3146_v53  ;;  %v4024_v57 = vadd.f32 %v2987_v38, %v1683_v11  ;;  %v3988_v28 = vpop.f32.mrb[22].mxu0 }
 0x215   : > { %v1702_v58 = vpop.f32.mrb[27].mxu1  ;;  %v3115_v5 = vadd.f32 %v4023_v60, %v5046_v63  ;;  %v4025_v19 = vadd.f32 %v3988_v28, %v3836_v54  ;;  %v2990_v31 = vpop.f32.mrb[23].mxu0 }
 0x216   : > { %v3113_v26 = vadd.f32 %v4024_v57, %v5046_v63  ;;  %v4026_v40 = vadd.f32 %v2990_v31, %v1686_v47 }
 0x217   : > { %v3151_v8 = vmax.f32 %v3115_v5, 0.0  ;;  %v3116_v27 = vadd.f32 %v4025_v19, %v5046_v63 }
 0x218   : > { %v3149_v50 = vmax.f32 %v3113_v26, 0.0  ;;  %v3114_v35 = vadd.f32 %v4026_v40, %v5046_v63 }
 0x219   : > { %3187 = vst [vmem:[%s5052_s20 + $0xb0] sm:$0xff] %v3151_v8  ;;  %v3152_v36 = vmax.f32 %v3116_v27, 0.0 }
 0x21a   : > { %v3843_v52 = vpop.f32.mrb[28].mxu1  ;;  %3185 = vst [vmem:[%s5052_s20 + $0xa0] sm:$0xff] %v3149_v50  ;;  %v3150_v20 = vmax.f32 %v3114_v35, 0.0  ;;  %v3991_v33 = vpop.f32.mrb[24].mxu0 }
 0x21b   : > { %v1715_v37 = vpop.f32.mrb[29].mxu1  ;;  %3188 = vst [vmem:[%s5052_s20 + $0xb8] sm:$0xff] %v3152_v36  ;;  %v4027_v62 = vadd.f32 %v3991_v33, %v3839_v22  ;;  %v3003_v39 = vpop.f32.mrb[25].mxu0 }
 0x21c   : > { %v3844_v44 = vpop.f32.mrb[30].mxu1  ;;  %3186 = vst [vmem:[%s5052_s20 + $0xa8] sm:$0xff] %v3150_v20  ;;  %v4028_v34 = vadd.f32 %v3003_v39, %v1699_v25  ;;  %v3992_v1 = vpop.f32.mrb[26].mxu0 }
 0x21d   : > { %v1718_v12 = vpop.f32.mrb[31].mxu1  ;;  %v3119_v16 = vadd.f32 %v4027_v62, %v5046_v63  ;;  %v4029_v46 = vadd.f32 %v3992_v1, %v3840_v24  ;;  %v3006_v48 = vpop.f32.mrb[27].mxu0 }
 0x21e   : > { %v3117_v30 = vadd.f32 %v4028_v34, %v5046_v63  ;;  %v4030_v0 = vadd.f32 %v3006_v48, %v1702_v58 }
 0x21f   : > { %v3155_v61 = vmax.f32 %v3119_v16, 0.0  ;;  %v3120_v3 = vadd.f32 %v4029_v46, %v5046_v63 }
 0x220   : > { %v3153_v4 = vmax.f32 %v3117_v30, 0.0  ;;  %v3118_v59 = vadd.f32 %v4030_v0, %v5046_v63 }
 0x221   : > { %3191 = vst [vmem:[%s5052_s20 + $0xd0] sm:$0xff] %v3155_v61  ;;  %v3156_v49 = vmax.f32 %v3120_v3, 0.0 }
 0x222   : > { %v3847_v6 = vpop.f32.mrb[32].mxu1  ;;  %3189 = vst [vmem:[%s5052_s20 + $0xc0] sm:$0xff] %v3153_v4  ;;  %v3154_v41 = vmax.f32 %v3118_v59, 0.0  ;;  %v3995_v32 = vpop.f32.mrb[28].mxu0 }
 0x223   : > { %v1731_v9 = vpop.f32.mrb[33].mxu1  ;;  %3192 = vst [vmem:[%s5052_s20 + $0xd8] sm:$0xff] %v3156_v49  ;;  %v4031_v7 = vadd.f32 %v3995_v32, %v3843_v52  ;;  %v3019_v10 = vpop.f32.mrb[29].mxu0 }
 0x224   : > { %v3848_v11 = vpop.f32.mrb[34].mxu1  ;;  %3190 = vst [vmem:[%s5052_s20 + $0xc8] sm:$0xff] %v3154_v41  ;;  %v4032_v43 = vadd.f32 %v3019_v10, %v1715_v37  ;;  %v3996_v13 = vpop.f32.mrb[30].mxu0 }
 0x225   : > { %v1734_v54 = vpop.f32.mrb[35].mxu1  ;;  %v3123_v2 = vadd.f32 %v4031_v7, %v5046_v63  ;;  %v4033_v42 = vadd.f32 %v3996_v13, %v3844_v44  ;;  %v3022_v47 = vpop.f32.mrb[31].mxu0 }
 0x226   : > { %v3121_v15 = vadd.f32 %v4032_v43, %v5046_v63  ;;  %v4034_v17 = vadd.f32 %v3022_v47, %v1718_v12 }
 0x227   : > { %v3159_v18 = vmax.f32 %v3123_v2, 0.0  ;;  %v3124_v14 = vadd.f32 %v4033_v42, %v5046_v63 }
 0x228   : > { %v3157_v51 = vmax.f32 %v3121_v15, 0.0  ;;  %v3122_v55 = vadd.f32 %v4034_v17, %v5046_v63 }
 0x229   : > { %3195 = vst [vmem:[%s5052_s20 + $0xf0] sm:$0xff] %v3159_v18  ;;  %v3160_v23 = vmax.f32 %v3124_v14, 0.0 }
 0x22a   : > { %3193 = vst [vmem:[%s5052_s20 + $0xe0] sm:$0xff] %v3157_v51  ;;  %v3158_v29 = vmax.f32 %v3122_v55, 0.0  ;;  %v3999_v21 = vpop.f32.mrb[32].mxu0 }
 0x22b   : > { %3196 = vst [vmem:[%s5052_s20 + $0xf8] sm:$0xff] %v3160_v23  ;;  %v4035_v45 = vadd.f32 %v3999_v21, %v3847_v6  ;;  %v3035_v22 = vpop.f32.mrb[33].mxu0 }
 0x22c   : > { %3194 = vst [vmem:[%s5052_s20 + $0xe8] sm:$0xff] %v3158_v29  ;;  %v4036_v53 = vadd.f32 %v3035_v22, %v1731_v9  ;;  %v4000_v56 = vpop.f32.mrb[34].mxu0 }
 0x22d   : > { %v3127_v25 = vadd.f32 %v4035_v45, %v5046_v63  ;;  %v4037_v60 = vadd.f32 %v4000_v56, %v3848_v11  ;;  %v3038_v38 = vpop.f32.mrb[35].mxu0 }
 0x22e   : > { %v3125_v24 = vadd.f32 %v4036_v53, %v5046_v63  ;;  %v4038_v57 = vadd.f32 %v3038_v38, %v1734_v54 }
 0x22f   : > { %v3163_v28 = vmax.f32 %v3127_v25, 0.0  ;;  %v3128_v58 = vadd.f32 %v4037_v60, %v5046_v63 }
 0x230   : > { %v3161_v5 = vmax.f32 %v3125_v24, 0.0  ;;  %v3126_v19 = vadd.f32 %v4038_v57, %v5046_v63 }
 0x231   : > { %3199 = vst [vmem:[%s5052_s20 + $0x110] sm:$0xff] %v3163_v28  ;;  %v3164_v31 = vmax.f32 %v3128_v58, 0.0 }
 0x232   : > { %3197 = vst [vmem:[%s5052_s20 + $0x100] sm:$0xff] %v3161_v5  ;;  %v3162_v26 = vmax.f32 %v3126_v19, 0.0 }
 0x233   : > { %3200 = vst [vmem:[%s5052_s20 + $0x118] sm:$0xff] %v3164_v31 }
 0x234   : > { %3198 = vst [vmem:[%s5052_s20 + $0x108] sm:$0xff] %v3162_v26 }
 0x235 PF: > { %s13_s14 = sadd.s32 1, %s4349_s14   ;;  %s5146_s12 = smov %s4345_s13 }
 0x236   : > { %p10_p5 = scmp.ge.s32.totalorder %s13_s14, 4   ;;  %s5147_s13 = smov %s5149_s15 }
 0x238   :  { %12 = sbr.rel (!%p10_p5) target bundleno = 2 (0x2), region = 76 }

</bundles_post_ra>
